<compile_context>
chip_gen: v5e
topology: v5e:2x2
jax: 0.10.0
libtpu: 0.0.40
codegen_flags: <defaults>
</compile_context>

<pallas_src>
import numpy as np
import jax
import jax.numpy as jnp
from jax.experimental import pallas as pl
from jax.experimental.pallas import tpu as pltpu

ALPHA_LIM = (float(np.exp(-1.0 / 5.0)), float(np.exp(-1.0 / 25.0)))
BETA_LIM = (float(np.exp(-1.0 / 30.0)), float(np.exp(-1.0 / 120.0)))
A_LIM = (-1.0, 1.0)
B_LIM = (0.0, 2.0)
THRESHOLD = 1.0   # config.threshold
PDROP = 0.1       # config.pdrop
BN_EPS = 1e-5     # nn.BatchNorm1d default eps

TIME_CHUNK = 16                   # time steps per grid step (static unroll)
VMEM_LIMIT = 48 * 1024 * 1024     # conservative: fits v7x's 64 MiB/TC budget


def _round_up(x, m):
    return ((x + m - 1) // m) * m


def _pad_to(x, shape):
    pads = [(0, s - d) for d, s in zip(x.shape, shape)]
    if all(p == (0, 0) for p in pads):
        return x
    return jnp.pad(x, pads)


# --------------------------------------------------------------------------
# Phase 1: feed-forward projection (time-major) + fused BatchNorm partial stats
# --------------------------------------------------------------------------
def _proj_bn_stats_kernel(x_ref, w_ref, wx_ref, stats_ref):
    TT, Bp, D = x_ref.shape
    H = w_ref.shape[1]
    # bf16 MXU matmul with f32 accumulation
    x2 = x_ref[...].reshape(TT * Bp, D)                                # bf16
    wx = jnp.dot(x2, w_ref[...], preferred_element_type=jnp.float32)  # (TT*Bp, H) f32
    wx_ref[...] = wx.astype(jnp.bfloat16).reshape(TT, Bp, H)
    # per-feature partial sums for BatchNorm (fused with the matmul pass)
    stats_ref[0, 0:1, :] = jnp.sum(wx, axis=0, keepdims=True)          # (1, H)
    stats_ref[0, 1:2, :] = jnp.sum(wx * wx, axis=0, keepdims=True)     # (1, H)


# --------------------------------------------------------------------------
# Phase 2: RadLIF recurrence (state carried in VMEM scratch across time chunks)
# Blocks are time-major: wx_ref / mask_ref / out_ref are (TT, BT2, H_pad).
# --------------------------------------------------------------------------
def _recurrence_kernel(wx_ref, mask_ref, vz_ref, pp_ref, u0_ref, w0_ref,
                       s0_ref, out_ref, u_sc, w_sc, s_sc):
    TT = wx_ref.shape[0]
    tj = pl.program_id(1)          # time-chunk index ("arbitrary", sequential)

    @pl.when(tj == 0)
    def _():                       # load initial membrane state for this batch tile
        u_sc[...] = u0_ref[...]
        w_sc[...] = w0_ref[...]
        s_sc[...] = s0_ref[...]

    Bp, H = u_sc.shape

    # Packed per-feature params; broadcasts hoisted out of the unrolled loop.
    par = pp_ref[...]                                   # (8, H)
    alpha = jnp.broadcast_to(par[0:1], (Bp, H))
    beta = jnp.broadcast_to(par[1:2], (Bp, H))
    a = jnp.broadcast_to(par[2:3], (Bp, H))
    b = jnp.broadcast_to(par[3:4], (Bp, H))
    scale = jnp.broadcast_to(par[4:5], (Bp, H))          # BN affine folded in
    shift = jnp.broadcast_to(par[5:6], (Bp, H))
    one_m_alpha = 1.0 - alpha
    vz = vz_ref[...]                                     # (H, H) bf16, diag zeroed
    inv_keep = 1.0 / (1.0 - PDROP)

    ut = u_sc[...]
    wt = w_sc[...]
    st = s_sc[...]

    for tt in range(TT):           # statically unrolled time chunk
        wx_t = wx_ref[tt].astype(jnp.float32) * scale + shift
        wt = beta * wt + a * ut + b * st
        rec = jnp.dot(st.astype(jnp.bfloat16), vz,
                      preferred_element_type=jnp.float32)
        ut = alpha * (ut - st) + one_m_alpha * (wx_t + rec - wt)
        st = (ut > THRESHOLD).astype(jnp.float32)        # boxcar forward
        # dropout: bf16 {0,1} keep mask streamed from HBM, scaled by 1/(1-p)
        out_ref[tt] = st * (mask_ref[tt].astype(jnp.float32) * inv_keep)

    u_sc[...] = ut                 # carry state to the next time chunk
    w_sc[...] = wt
    s_sc[...] = st


# --------------------------------------------------------------------------
# Wrapper
# --------------------------------------------------------------------------
def radlif_forward(x, params, init_states, seed):
    """x: (B, T, D) float32 -> spikes (B, T, H) float32."""
    B, T, D = x.shape
    H = params["W"].shape[1]

    # ---- tiling / padding constants ----
    H_pad = _round_up(H, 128)                 # lane-dense hidden dim
    D_pad = _round_up(D, 128)
    TT = TIME_CHUNK
    T_pad = _round_up(T, TT)
    B_pad0 = _round_up(B, 8)
    if B_pad0 >= 16:
        # >= 2 batch tiles when possible (v7x second TensorCore), capped at 128
        BT2 = max(8, min(128, (B_pad0 // 2) // 8 * 8))
    else:
        BT2 = B_pad0
    B_pad = _round_up(B_pad0, BT2)
    n_b2 = B_pad // BT2
    n_tc = T_pad // TT

    # ---- pad / preprocess operands (zero padding; sliced off at the end) ----
    # time-major, bf16 input for phase 1
    x_tm = _pad_to(jnp.transpose(x, (1, 0, 2)).astype(jnp.bfloat16),
                   (T_pad, B_pad, D_pad))
    w_p = _pad_to(params["W"], (D_pad, H_pad)).astype(jnp.bfloat16)
    # zero V's diagonal once and cast for the MXU
    vz = params["V"] * (1.0 - jnp.eye(H, dtype=params["V"].dtype))
    vz_p = _pad_to(vz, (H_pad, H_pad)).astype(jnp.bfloat16)
    alpha_p = _pad_to(jnp.clip(params["alpha"], *ALPHA_LIM), (1, H_pad))
    beta_p = _pad_to(jnp.clip(params["beta"], *BETA_LIM), (1, H_pad))
    a_p = _pad_to(jnp.clip(params["a"], *A_LIM), (1, H_pad))
    b_p = _pad_to(jnp.clip(params["b"], *B_LIM), (1, H_pad))
    u0_p = _pad_to(init_states["ut"], (B_pad, H_pad))
    w0_p = _pad_to(init_states["wt"], (B_pad, H_pad))
    s0_p = _pad_to(init_states["st"], (B_pad, H_pad))

    # ---- phase 1: Wx projection (bf16 out) + BN partial stats, time tiles ----
    wx_p, stats = pl.pallas_call(
        _proj_bn_stats_kernel,
        grid=(n_tc,),
        in_specs=[
            pl.BlockSpec((TT, B_pad, D_pad), lambda i: (i, 0, 0)),
            pl.BlockSpec((D_pad, H_pad), lambda i: (0, 0)),
        ],
        out_specs=[
            pl.BlockSpec((TT, B_pad, H_pad), lambda i: (i, 0, 0)),
            pl.BlockSpec((1, 2, H_pad), lambda i: (i, 0, 0)),
        ],
        out_shape=[
            jax.ShapeDtypeStruct((T_pad, B_pad, H_pad), jnp.bfloat16),
            jax.ShapeDtypeStruct((n_tc, 2, H_pad), jnp.float32),
        ],
        compiler_params=pltpu.CompilerParams(
            dimension_semantics=("parallel",), vmem_limit_bytes=VMEM_LIMIT),
    )(x_tm, w_p)

    # ---- BatchNorm1d affine from batch statistics (training mode, biased var).
    #      Padded rows/columns are zero and do not perturb the real sums. ----
    n_rows = float(B * T)
    sums = jnp.sum(stats, axis=0)                          # (2, H_pad)
    mean = sums[0] / n_rows
    var = jnp.maximum(sums[1] / n_rows - mean * mean, 0.0)
    rstd = jax.lax.rsqrt(var + BN_EPS)
    gamma_p = _pad_to(params["gamma"], (1, H_pad))
    bnb_p = _pad_to(params["bn_beta"], (1, H_pad))
    scale = (gamma_p * rstd[None, :]).astype(jnp.float32)  # (1, H_pad)
    shift = (bnb_p - mean[None, :] * scale).astype(jnp.float32)
    # TODO(synk): BatchNorm running_mean/running_var update (stateful training
    # side effect of the module) is not part of the functional forward; omitted.

    # pack the 6 per-feature vectors into a single (8, H_pad) operand
    zero_row = jnp.zeros((1, H_pad), jnp.float32)
    packed = jnp.concatenate(
        [alpha_p, beta_p, a_p, b_p, scale, shift, zero_row, zero_row],
        axis=0).astype(jnp.float32)                        # (8, H_pad)

    # deterministic dropout keep-mask ({0,1} bf16), time-major
    keep = jax.random.bernoulli(jax.random.PRNGKey(seed), p=1.0 - PDROP,
                                shape=(T_pad, B_pad, H_pad)).astype(jnp.bfloat16)

    # ---- phase 2: RadLIF recurrence, grid = (batch tiles, time chunks) ----
    s_p = pl.pallas_call(
        _recurrence_kernel,
        grid=(n_b2, n_tc),
        in_specs=[
            pl.BlockSpec((TT, BT2, H_pad), lambda i, j: (j, i, 0)),   # Wx (bf16 stream)
            pl.BlockSpec((TT, BT2, H_pad), lambda i, j: (j, i, 0)),   # dropout keep mask
            pl.BlockSpec((H_pad, H_pad), lambda i, j: (0, 0)),        # V (resident)
            pl.BlockSpec((8, H_pad), lambda i, j: (0, 0)),            # packed params
            pl.BlockSpec((BT2, H_pad), lambda i, j: (i, 0)),          # ut0
            pl.BlockSpec((BT2, H_pad), lambda i, j: (i, 0)),          # wt0
            pl.BlockSpec((BT2, H_pad), lambda i, j: (i, 0)),          # st0
        ],
        out_specs=pl.BlockSpec((TT, BT2, H_pad), lambda i, j: (j, i, 0)),
        out_shape=jax.ShapeDtypeStruct((T_pad, B_pad, H_pad), jnp.float32),
        scratch_shapes=[pltpu.VMEM((BT2, H_pad), jnp.float32)] * 3,
        compiler_params=pltpu.CompilerParams(
            dimension_semantics=("parallel", "arbitrary"),
            vmem_limit_bytes=VMEM_LIMIT),
    )(wx_p, keep, vz_p, packed, u0_p, w0_p, s0_p)

    # back to (B, T, H)
    return jnp.transpose(s_p[:T, :B, :H], (1, 0, 2))


def init_params(key, input_size, hidden_size):
    """Deterministic stand-in for RadLIFLayer.__init__ parameter shapes."""
    ks = jax.random.split(key, 6)
    lim = 1.0 / np.sqrt(input_size)
    # nn.Linear(input, hidden, bias=False) weight, stored transposed: (D, H)
    W = jax.random.uniform(ks[0], (input_size, hidden_size), jnp.float32, -lim, lim)
    # nn.init.orthogonal_(V.weight): orthogonal (H, H)
    Vn = jax.random.normal(ks[1], (hidden_size, hidden_size), jnp.float32)
    Q, _ = jnp.linalg.qr(Vn)
    V = Q.astype(jnp.float32)
    alpha = jax.random.uniform(ks[2], (1, hidden_size), jnp.float32,
                               ALPHA_LIM[0], ALPHA_LIM[1])
    beta = jax.random.uniform(ks[3], (1, hidden_size), jnp.float32,
                              BETA_LIM[0], BETA_LIM[1])
    a = jax.random.uniform(ks[4], (1, hidden_size), jnp.float32, A_LIM[0], A_LIM[1])
    b = jax.random.uniform(ks[5], (1, hidden_size), jnp.float32, B_LIM[0], B_LIM[1])
    gamma = jnp.ones((1, hidden_size), jnp.float32)      # BatchNorm weight
    bn_beta = jnp.zeros((1, hidden_size), jnp.float32)   # BatchNorm bias
    return dict(W=W, V=V, alpha=alpha, beta=beta, a=a, b=b,
                gamma=gamma, bn_beta=bn_beta)


if __name__ == "__main__":
    key = jax.random.PRNGKey(0)
    B, T, D, H = 4, 8, 64, 32   # small shapes: batch, time steps, input, hidden

    k_x, k_p, k_u, k_w, k_s = jax.random.split(key, 5)
    x = jax.random.normal(k_x, (B, T, D), jnp.float32)
    params = init_params(k_p, D, H)
    # torch.rand(...) initial states, made deterministic
    init_states = {
        "ut": jax.random.uniform(k_u, (B, H), jnp.float32),
        "wt": jax.random.uniform(k_w, (B, H), jnp.float32),
        "st": jax.random.uniform(k_s, (B, H), jnp.float32),
    }

    fwd = jax.jit(lambda xx, pp, ss: radlif_forward(xx, pp, ss, seed=1234))
    s = fwd(x, params, init_states)
    s = jax.block_until_ready(s)

    assert s.shape == (B, T, H), s.shape
    assert bool(jnp.all(jnp.isfinite(s)))
    # spikes are {0, 1} scaled by 1/(1-p) after dropout
    inv_keep = 1.0 / (1.0 - PDROP)
    ok = jnp.all((jnp.abs(s) < 1e-6) | (jnp.abs(s - inv_keep) < 1e-5))
    assert bool(ok)
    print("KERNEL_OK")
</pallas_src>

<mosaic_0001>
module attributes {stable_mosaic.version = 11 : i64} {
  func.func @_proj_bn_stats_kernel(%arg0: i32, %arg1: memref<16x8x128xbf16, #tpu.memory_space<vmem>>, %arg2: memref<128x128xbf16, #tpu.memory_space<vmem>>, %arg3: memref<16x8x128xbf16, #tpu.memory_space<vmem>>, %arg4: memref<1x2x128xf32, #tpu.memory_space<vmem>>) attributes {dimension_semantics = [#tpu.dimension_semantics<parallel>], iteration_bounds = array<i64: 1>, scalar_prefetch = 0 : i64, scratch_operands = 0 : i64, tpu.core_type = #tpu.core_type<tc>, window_params = [{transform_indices = @transform_0, window_bounds = array<i64: 16, 8, 128>}, {pipeline_mode = #tpu.pipeline_mode<synchronous>, transform_indices = @transform_1, window_bounds = array<i64: 128, 128>}, {transform_indices = @transform_2, window_bounds = array<i64: 16, 8, 128>}, {transform_indices = @transform_3, window_bounds = array<i64: 1, 2, 128>}]} {
    %c0 = arith.constant 0 : index
    %c0_0 = arith.constant 0 : index
    %c0_1 = arith.constant 0 : index
    %0 = vector.load %arg1[%c0, %c0_0, %c0_1] : memref<16x8x128xbf16, #tpu.memory_space<vmem>>, vector<16x8x128xbf16>
    %1 = vector.shape_cast %0 : vector<16x8x128xbf16> to vector<128x128xbf16>
    %c0_2 = arith.constant 0 : index
    %c0_3 = arith.constant 0 : index
    %2 = vector.load %arg2[%c0_2, %c0_3] : memref<128x128xbf16, #tpu.memory_space<vmem>>, vector<128x128xbf16>
    %cst = arith.constant dense<0.000000e+00> : vector<128x128xf32>
    %3 = tpu.matmul %1, %2, %cst {dimension_numbers = #tpu.dot_dimension_numbers<[1], [0], [0], [1], [0, 0, 1, 1], [], []>} : vector<128x128xbf16>, vector<128x128xbf16>, vector<128x128xf32> -> vector<128x128xf32>
    %4 = arith.truncf %3 : vector<128x128xf32> to vector<128x128xbf16>
    %5 = vector.shape_cast %4 : vector<128x128xbf16> to vector<16x8x128xbf16>
    %c0_4 = arith.constant 0 : index
    %c0_5 = arith.constant 0 : index
    %c0_6 = arith.constant 0 : index
    %6 = vector.load %arg3[%c0_4, %c0_5, %c0_6] : memref<16x8x128xbf16, #tpu.memory_space<vmem>>, vector<16x8x128xbf16>
    tpu.vector_store %arg3[%c0_4, %c0_5, %c0_6], %5 {strides = array<i32>} : memref<16x8x128xbf16, #tpu.memory_space<vmem>>, vector<16x8x128xbf16>,
    %cst_7 = arith.constant dense<0.000000e+00> : vector<128xf32>
    %7 = vector.multi_reduction <add>, %3, %cst_7 [0] : vector<128x128xf32> to vector<128xf32>
    %8 = vector.shape_cast %7 : vector<128xf32> to vector<1x128xf32>
    %c0_8 = arith.constant 0 : index
    %c0_9 = arith.constant 0 : index
    %c0_10 = arith.constant 0 : index
    %9 = vector.load %arg4[%c0_8, %c0_9, %c0_10] : memref<1x2x128xf32, #tpu.memory_space<vmem>>, vector<1x1x128xf32>
    %10 = vector.shape_cast %9 : vector<1x1x128xf32> to vector<1x128xf32>
    %11 = vector.shape_cast %8 : vector<1x128xf32> to vector<1x1x128xf32>
    tpu.vector_store %arg4[%c0_8, %c0_9, %c0_10], %11 {strides = array<i32>} : memref<1x2x128xf32, #tpu.memory_space<vmem>>, vector<1x1x128xf32>,
    %12 = arith.mulf %3, %3 : vector<128x128xf32>
    %cst_11 = arith.constant dense<0.000000e+00> : vector<128xf32>
    %13 = vector.multi_reduction <add>, %12, %cst_11 [0] : vector<128x128xf32> to vector<128xf32>
    %14 = vector.shape_cast %13 : vector<128xf32> to vector<1x128xf32>
    %c0_12 = arith.constant 0 : index
    %c1 = arith.constant 1 : index
    %c0_13 = arith.constant 0 : index
    %15 = vector.load %arg4[%c0_12, %c1, %c0_13] : memref<1x2x128xf32, #tpu.memory_space<vmem>>, vector<1x1x128xf32>
    %16 = vector.shape_cast %15 : vector<1x1x128xf32> to vector<1x128xf32>
    %17 = vector.shape_cast %14 : vector<1x128xf32> to vector<1x1x128xf32>
    tpu.vector_store %arg4[%c0_12, %c1, %c0_13], %17 {strides = array<i32>} : memref<1x2x128xf32, #tpu.memory_space<vmem>>, vector<1x1x128xf32>,
    return
  }
  func.func @transform_0(%arg0: i32) -> (i32, i32, i32) {
    %c0_i32 = arith.constant 0 : i32
    %c0_i32_0 = arith.constant 0 : i32
    %c0_i32_1 = arith.constant 0 : i32
    return %arg0, %c0_i32, %c0_i32_0 : i32, i32, i32
  }
  func.func @transform_1(%arg0: i32) -> (i32, i32) {
    %c0_i32 = arith.constant 0 : i32
    %c0_i32_0 = arith.constant 0 : i32
    %c0_i32_1 = arith.constant 0 : i32
    return %c0_i32, %c0_i32_0 : i32, i32
  }
  func.func @transform_2(%arg0: i32) -> (i32, i32, i32) {
    %c0_i32 = arith.constant 0 : i32
    %c0_i32_0 = arith.constant 0 : i32
    %c0_i32_1 = arith.constant 0 : i32
    return %arg0, %c0_i32, %c0_i32_0 : i32, i32, i32
  }
  func.func @transform_3(%arg0: i32) -> (i32, i32, i32) {
    %c0_i32 = arith.constant 0 : i32
    %c0_i32_0 = arith.constant 0 : i32
    %c0_i32_1 = arith.constant 0 : i32
    return %arg0, %c0_i32, %c0_i32_0 : i32, i32, i32
  }
}

module attributes {stable_mosaic.version = 11 : i64} {
  func.func @_recurrence_kernel(%arg0: i32, %arg1: i32, %arg2: memref<16x8x128xbf16, #tpu.memory_space<vmem>>, %arg3: memref<16x8x128xbf16, #tpu.memory_space<vmem>>, %arg4: memref<128x128xbf16, #tpu.memory_space<vmem>>, %arg5: memref<8x128xf32, #tpu.memory_space<vmem>>, %arg6: memref<8x128xf32, #tpu.memory_space<vmem>>, %arg7: memref<8x128xf32, #tpu.memory_space<vmem>>, %arg8: memref<8x128xf32, #tpu.memory_space<vmem>>, %arg9: memref<16x8x128xf32, #tpu.memory_space<vmem>>, %arg10: memref<8x128xf32, #tpu.memory_space<vmem>>, %arg11: memref<8x128xf32, #tpu.memory_space<vmem>>, %arg12: memref<8x128xf32, #tpu.memory_space<vmem>>) attributes {dimension_semantics = [#tpu.dimension_semantics<parallel>, #tpu.dimension_semantics<arbitrary>], iteration_bounds = array<i64: 1, 1>, scalar_prefetch = 0 : i64, scratch_operands = 3 : i64, tpu.core_type = #tpu.core_type<tc>, window_params = [{transform_indices = @transform_0, window_bounds = array<i64: 16, 8, 128>}, {transform_indices = @transform_1, window_bounds = array<i64: 16, 8, 128>}, {pipeline_mode = #tpu.pipeline_mode<synchronous>, transform_indices = @transform_2, window_bounds = array<i64: 128, 128>}, {pipeline_mode = #tpu.pipeline_mode<synchronous>, transform_indices = @transform_3, window_bounds = array<i64: 8, 128>}, {transform_indices = @transform_4, window_bounds = array<i64: 8, 128>}, {transform_indices = @transform_5, window_bounds = array<i64: 8, 128>}, {transform_indices = @transform_6, window_bounds = array<i64: 8, 128>}, {transform_indices = @transform_7, window_bounds = array<i64: 16, 8, 128>}]} {
    %c0_i32 = arith.constant 0 : i32
    %0 = arith.cmpi eq, %arg1, %c0_i32 : i32
    %1 = arith.extui %0 : i1 to i32
    %c0_i32_0 = arith.constant 0 : i32
    %2 = arith.cmpi ne, %1, %c0_i32_0 : i32
    scf.if %2 {
      %c0_193 = arith.constant 0 : index
      %c0_194 = arith.constant 0 : index
      %527 = vector.load %arg6[%c0_193, %c0_194] : memref<8x128xf32, #tpu.memory_space<vmem>>, vector<8x128xf32>
      %c0_195 = arith.constant 0 : index
      %c0_196 = arith.constant 0 : index
      %528 = vector.load %arg10[%c0_195, %c0_196] : memref<8x128xf32, #tpu.memory_space<vmem>>, vector<8x128xf32>
      tpu.vector_store %arg10[%c0_195, %c0_196], %527 {strides = array<i32>} : memref<8x128xf32, #tpu.memory_space<vmem>>, vector<8x128xf32>,
      %c0_197 = arith.constant 0 : index
      %c0_198 = arith.constant 0 : index
      %529 = vector.load %arg7[%c0_197, %c0_198] : memref<8x128xf32, #tpu.memory_space<vmem>>, vector<8x128xf32>
      %c0_199 = arith.constant 0 : index
      %c0_200 = arith.constant 0 : index
      %530 = vector.load %arg11[%c0_199, %c0_200] : memref<8x128xf32, #tpu.memory_space<vmem>>, vector<8x128xf32>
      tpu.vector_store %arg11[%c0_199, %c0_200], %529 {strides = array<i32>} : memref<8x128xf32, #tpu.memory_space<vmem>>, vector<8x128xf32>,
      %c0_201 = arith.constant 0 : index
      %c0_202 = arith.constant 0 : index
      %531 = vector.load %arg8[%c0_201, %c0_202] : memref<8x128xf32, #tpu.memory_space<vmem>>, vector<8x128xf32>
      %c0_203 = arith.constant 0 : index
      %c0_204 = arith.constant 0 : index
      %532 = vector.load %arg12[%c0_203, %c0_204] : memref<8x128xf32, #tpu.memory_space<vmem>>, vector<8x128xf32>
      tpu.vector_store %arg12[%c0_203, %c0_204], %531 {strides = array<i32>} : memref<8x128xf32, #tpu.memory_space<vmem>>, vector<8x128xf32>,
    } else {
    }
    %c0 = arith.constant 0 : index
    %c0_1 = arith.constant 0 : index
    %3 = vector.load %arg5[%c0, %c0_1] : memref<8x128xf32, #tpu.memory_space<vmem>>, vector<8x128xf32>
    %4 = vector.extract_strided_slice %3 {offsets = [0, 0], sizes = [1, 128], strides = [1, 1]} : vector<8x128xf32> to vector<1x128xf32>
    %5 = vector.shape_cast %4 : vector<1x128xf32> to vector<1x128xf32>
    %6 = vector.broadcast %5 : vector<1x128xf32> to vector<8x128xf32>
    %7 = vector.extract_strided_slice %3 {offsets = [1, 0], sizes = [1, 128], strides = [1, 1]} : vector<8x128xf32> to vector<1x128xf32>
    %8 = vector.shape_cast %7 : vector<1x128xf32> to vector<1x128xf32>
    %9 = vector.broadcast %8 : vector<1x128xf32> to vector<8x128xf32>
    %10 = vector.extract_strided_slice %3 {offsets = [2, 0], sizes = [1, 128], strides = [1, 1]} : vector<8x128xf32> to vector<1x128xf32>
    %11 = vector.shape_cast %10 : vector<1x128xf32> to vector<1x128xf32>
    %12 = vector.broadcast %11 : vector<1x128xf32> to vector<8x128xf32>
    %13 = vector.extract_strided_slice %3 {offsets = [3, 0], sizes = [1, 128], strides = [1, 1]} : vector<8x128xf32> to vector<1x128xf32>
    %14 = vector.shape_cast %13 : vector<1x128xf32> to vector<1x128xf32>
    %15 = vector.broadcast %14 : vector<1x128xf32> to vector<8x128xf32>
    %16 = vector.extract_strided_slice %3 {offsets = [4, 0], sizes = [1, 128], strides = [1, 1]} : vector<8x128xf32> to vector<1x128xf32>
    %17 = vector.shape_cast %16 : vector<1x128xf32> to vector<1x128xf32>
    %18 = vector.broadcast %17 : vector<1x128xf32> to vector<8x128xf32>
    %19 = vector.extract_strided_slice %3 {offsets = [5, 0], sizes = [1, 128], strides = [1, 1]} : vector<8x128xf32> to vector<1x128xf32>
    %20 = vector.shape_cast %19 : vector<1x128xf32> to vector<1x128xf32>
    %21 = vector.broadcast %20 : vector<1x128xf32> to vector<8x128xf32>
    %cst = arith.constant 1.000000e+00 : f32
    %22 = vector.broadcast %cst : f32 to vector<8x128xf32>
    %23 = arith.subf %22, %6 : vector<8x128xf32>
    %c0_2 = arith.constant 0 : index
    %c0_3 = arith.constant 0 : index
    %24 = vector.load %arg4[%c0_2, %c0_3] : memref<128x128xbf16, #tpu.memory_space<vmem>>, vector<128x128xbf16>
    %c0_4 = arith.constant 0 : index
    %c0_5 = arith.constant 0 : index
    %25 = vector.load %arg10[%c0_4, %c0_5] : memref<8x128xf32, #tpu.memory_space<vmem>>, vector<8x128xf32>
    %c0_6 = arith.constant 0 : index
    %c0_7 = arith.constant 0 : index
    %26 = vector.load %arg11[%c0_6, %c0_7] : memref<8x128xf32, #tpu.memory_space<vmem>>, vector<8x128xf32>
    %c0_8 = arith.constant 0 : index
    %c0_9 = arith.constant 0 : index
    %27 = vector.load %arg12[%c0_8, %c0_9] : memref<8x128xf32, #tpu.memory_space<vmem>>, vector<8x128xf32>
    %c0_10 = arith.constant 0 : index
    %c0_11 = arith.constant 0 : index
    %c0_12 = arith.constant 0 : index
    %28 = vector.load %arg2[%c0_10, %c0_11, %c0_12] : memref<16x8x128xbf16, #tpu.memory_space<vmem>>, vector<1x8x128xbf16>
    %29 = vector.shape_cast %28 : vector<1x8x128xbf16> to vector<8x128xbf16>
    %30 = arith.extf %29 : vector<8x128xbf16> to vector<8x128xf32>
    %31 = arith.mulf %30, %18 : vector<8x128xf32>
    %32 = arith.addf %31, %21 : vector<8x128xf32>
    %33 = arith.mulf %9, %26 : vector<8x128xf32>
    %34 = arith.mulf %12, %25 : vector<8x128xf32>
    %35 = arith.addf %33, %34 : vector<8x128xf32>
    %36 = arith.mulf %15, %27 : vector<8x128xf32>
    %37 = arith.addf %35, %36 : vector<8x128xf32>
    %38 = arith.truncf %27 : vector<8x128xf32> to vector<8x128xbf16>
    %cst_13 = arith.constant dense<0.000000e+00> : vector<8x128xf32>
    %39 = tpu.matmul %38, %24, %cst_13 {dimension_numbers = #tpu.dot_dimension_numbers<[1], [0], [0], [1], [0, 0, 1, 1], [], []>} : vector<8x128xbf16>, vector<128x128xbf16>, vector<8x128xf32> -> vector<8x128xf32>
    %40 = arith.subf %25, %27 : vector<8x128xf32>
    %41 = arith.mulf %6, %40 : vector<8x128xf32>
    %42 = arith.addf %32, %39 : vector<8x128xf32>
    %43 = arith.subf %42, %37 : vector<8x128xf32>
    %44 = arith.mulf %23, %43 : vector<8x128xf32>
    %45 = arith.addf %41, %44 : vector<8x128xf32>
    %cst_14 = arith.constant 1.000000e+00 : f32
    %46 = vector.broadcast %cst_14 : f32 to vector<8x128xf32>
    %47 = arith.cmpf ogt, %45, %46 : vector<8x128xf32>
    %48 = arith.extui %47 : vector<8x128xi1> to vector<8x128xi32>
    %49 = arith.sitofp %48 : vector<8x128xi32> to vector<8x128xf32>
    %c0_15 = arith.constant 0 : index
    %c0_16 = arith.constant 0 : index
    %c0_17 = arith.constant 0 : index
    %50 = vector.load %arg3[%c0_15, %c0_16, %c0_17] : memref<16x8x128xbf16, #tpu.memory_space<vmem>>, vector<1x8x128xbf16>
    %51 = vector.shape_cast %50 : vector<1x8x128xbf16> to vector<8x128xbf16>
    %52 = arith.extf %51 : vector<8x128xbf16> to vector<8x128xf32>
    %cst_18 = arith.constant 1.11111116 : f32
    %53 = vector.broadcast %cst_18 : f32 to vector<8x128xf32>
    %54 = arith.mulf %52, %53 : vector<8x128xf32>
    %55 = arith.mulf %49, %54 : vector<8x128xf32>
    %c0_19 = arith.constant 0 : index
    %c0_20 = arith.constant 0 : index
    %c0_21 = arith.constant 0 : index
    %56 = vector.load %arg9[%c0_19, %c0_20, %c0_21] : memref<16x8x128xf32, #tpu.memory_space<vmem>>, vector<1x8x128xf32>
    %57 = vector.shape_cast %56 : vector<1x8x128xf32> to vector<8x128xf32>
    %58 = vector.shape_cast %55 : vector<8x128xf32> to vector<1x8x128xf32>
    tpu.vector_store %arg9[%c0_19, %c0_20, %c0_21], %58 {strides = array<i32>} : memref<16x8x128xf32, #tpu.memory_space<vmem>>, vector<1x8x128xf32>,
    %c1 = arith.constant 1 : index
    %c0_22 = arith.constant 0 : index
    %c0_23 = arith.constant 0 : index
    %59 = vector.load %arg2[%c1, %c0_22, %c0_23] : memref<16x8x128xbf16, #tpu.memory_space<vmem>>, vector<1x8x128xbf16>
    %60 = vector.shape_cast %59 : vector<1x8x128xbf16> to vector<8x128xbf16>
    %61 = arith.extf %60 : vector<8x128xbf16> to vector<8x128xf32>
    %62 = arith.mulf %61, %18 : vector<8x128xf32>
    %63 = arith.addf %62, %21 : vector<8x128xf32>
    %64 = arith.mulf %9, %37 : vector<8x128xf32>
    %65 = arith.mulf %12, %45 : vector<8x128xf32>
    %66 = arith.addf %64, %65 : vector<8x128xf32>
    %67 = arith.mulf %15, %49 : vector<8x128xf32>
    %68 = arith.addf %66, %67 : vector<8x128xf32>
    %69 = arith.truncf %49 : vector<8x128xf32> to vector<8x128xbf16>
    %cst_24 = arith.constant dense<0.000000e+00> : vector<8x128xf32>
    %70 = tpu.matmul %69, %24, %cst_24 {dimension_numbers = #tpu.dot_dimension_numbers<[1], [0], [0], [1], [0, 0, 1, 1], [], []>} : vector<8x128xbf16>, vector<128x128xbf16>, vector<8x128xf32> -> vector<8x128xf32>
    %71 = arith.subf %45, %49 : vector<8x128xf32>
    %72 = arith.mulf %6, %71 : vector<8x128xf32>
    %73 = arith.addf %63, %70 : vector<8x128xf32>
    %74 = arith.subf %73, %68 : vector<8x128xf32>
    %75 = arith.mulf %23, %74 : vector<8x128xf32>
    %76 = arith.addf %72, %75 : vector<8x128xf32>
    %cst_25 = arith.constant 1.000000e+00 : f32
    %77 = vector.broadcast %cst_25 : f32 to vector<8x128xf32>
    %78 = arith.cmpf ogt, %76, %77 : vector<8x128xf32>
    %79 = arith.extui %78 : vector<8x128xi1> to vector<8x128xi32>
    %80 = arith.sitofp %79 : vector<8x128xi32> to vector<8x128xf32>
    %c1_26 = arith.constant 1 : index
    %c0_27 = arith.constant 0 : index
    %c0_28 = arith.constant 0 : index
    %81 = vector.load %arg3[%c1_26, %c0_27, %c0_28] : memref<16x8x128xbf16, #tpu.memory_space<vmem>>, vector<1x8x128xbf16>
    %82 = vector.shape_cast %81 : vector<1x8x128xbf16> to vector<8x128xbf16>
    %83 = arith.extf %82 : vector<8x128xbf16> to vector<8x128xf32>
    %cst_29 = arith.constant 1.11111116 : f32
    %84 = vector.broadcast %cst_29 : f32 to vector<8x128xf32>
    %85 = arith.mulf %83, %84 : vector<8x128xf32>
    %86 = arith.mulf %80, %85 : vector<8x128xf32>
    %c1_30 = arith.constant 1 : index
    %c0_31 = arith.constant 0 : index
    %c0_32 = arith.constant 0 : index
    %87 = vector.load %arg9[%c1_30, %c0_31, %c0_32] : memref<16x8x128xf32, #tpu.memory_space<vmem>>, vector<1x8x128xf32>
    %88 = vector.shape_cast %87 : vector<1x8x128xf32> to vector<8x128xf32>
    %89 = vector.shape_cast %86 : vector<8x128xf32> to vector<1x8x128xf32>
    tpu.vector_store %arg9[%c1_30, %c0_31, %c0_32], %89 {strides = array<i32>} : memref<16x8x128xf32, #tpu.memory_space<vmem>>, vector<1x8x128xf32>,
    %c2 = arith.constant 2 : index
    %c0_33 = arith.constant 0 : index
    %c0_34 = arith.constant 0 : index
    %90 = vector.load %arg2[%c2, %c0_33, %c0_34] : memref<16x8x128xbf16, #tpu.memory_space<vmem>>, vector<1x8x128xbf16>
    %91 = vector.shape_cast %90 : vector<1x8x128xbf16> to vector<8x128xbf16>
    %92 = arith.extf %91 : vector<8x128xbf16> to vector<8x128xf32>
    %93 = arith.mulf %92, %18 : vector<8x128xf32>
    %94 = arith.addf %93, %21 : vector<8x128xf32>
    %95 = arith.mulf %9, %68 : vector<8x128xf32>
    %96 = arith.mulf %12, %76 : vector<8x128xf32>
    %97 = arith.addf %95, %96 : vector<8x128xf32>
    %98 = arith.mulf %15, %80 : vector<8x128xf32>
    %99 = arith.addf %97, %98 : vector<8x128xf32>
    %100 = arith.truncf %80 : vector<8x128xf32> to vector<8x128xbf16>
    %cst_35 = arith.constant dense<0.000000e+00> : vector<8x128xf32>
    %101 = tpu.matmul %100, %24, %cst_35 {dimension_numbers = #tpu.dot_dimension_numbers<[1], [0], [0], [1], [0, 0, 1, 1], [], []>} : vector<8x128xbf16>, vector<128x128xbf16>, vector<8x128xf32> -> vector<8x128xf32>
    %102 = arith.subf %76, %80 : vector<8x128xf32>
    %103 = arith.mulf %6, %102 : vector<8x128xf32>
    %104 = arith.addf %94, %101 : vector<8x128xf32>
    %105 = arith.subf %104, %99 : vector<8x128xf32>
    %106 = arith.mulf %23, %105 : vector<8x128xf32>
    %107 = arith.addf %103, %106 : vector<8x128xf32>
    %cst_36 = arith.constant 1.000000e+00 : f32
    %108 = vector.broadcast %cst_36 : f32 to vector<8x128xf32>
    %109 = arith.cmpf ogt, %107, %108 : vector<8x128xf32>
    %110 = arith.extui %109 : vector<8x128xi1> to vector<8x128xi32>
    %111 = arith.sitofp %110 : vector<8x128xi32> to vector<8x128xf32>
    %c2_37 = arith.constant 2 : index
    %c0_38 = arith.constant 0 : index
    %c0_39 = arith.constant 0 : index
    %112 = vector.load %arg3[%c2_37, %c0_38, %c0_39] : memref<16x8x128xbf16, #tpu.memory_space<vmem>>, vector<1x8x128xbf16>
    %113 = vector.shape_cast %112 : vector<1x8x128xbf16> to vector<8x128xbf16>
    %114 = arith.extf %113 : vector<8x128xbf16> to vector<8x128xf32>
    %cst_40 = arith.constant 1.11111116 : f32
    %115 = vector.broadcast %cst_40 : f32 to vector<8x128xf32>
    %116 = arith.mulf %114, %115 : vector<8x128xf32>
    %117 = arith.mulf %111, %116 : vector<8x128xf32>
    %c2_41 = arith.constant 2 : index
    %c0_42 = arith.constant 0 : index
    %c0_43 = arith.constant 0 : index
    %118 = vector.load %arg9[%c2_41, %c0_42, %c0_43] : memref<16x8x128xf32, #tpu.memory_space<vmem>>, vector<1x8x128xf32>
    %119 = vector.shape_cast %118 : vector<1x8x128xf32> to vector<8x128xf32>
    %120 = vector.shape_cast %117 : vector<8x128xf32> to vector<1x8x128xf32>
    tpu.vector_store %arg9[%c2_41, %c0_42, %c0_43], %120 {strides = array<i32>} : memref<16x8x128xf32, #tpu.memory_space<vmem>>, vector<1x8x128xf32>,
    %c3 = arith.constant 3 : index
    %c0_44 = arith.constant 0 : index
    %c0_45 = arith.constant 0 : index
    %121 = vector.load %arg2[%c3, %c0_44, %c0_45] : memref<16x8x128xbf16, #tpu.memory_space<vmem>>, vector<1x8x128xbf16>
    %122 = vector.shape_cast %121 : vector<1x8x128xbf16> to vector<8x128xbf16>
    %123 = arith.extf %122 : vector<8x128xbf16> to vector<8x128xf32>
    %124 = arith.mulf %123, %18 : vector<8x128xf32>
    %125 = arith.addf %124, %21 : vector<8x128xf32>
    %126 = arith.mulf %9, %99 : vector<8x128xf32>
    %127 = arith.mulf %12, %107 : vector<8x128xf32>
    %128 = arith.addf %126, %127 : vector<8x128xf32>
    %129 = arith.mulf %15, %111 : vector<8x128xf32>
    %130 = arith.addf %128, %129 : vector<8x128xf32>
    %131 = arith.truncf %111 : vector<8x128xf32> to vector<8x128xbf16>
    %cst_46 = arith.constant dense<0.000000e+00> : vector<8x128xf32>
    %132 = tpu.matmul %131, %24, %cst_46 {dimension_numbers = #tpu.dot_dimension_numbers<[1], [0], [0], [1], [0, 0, 1, 1], [], []>} : vector<8x128xbf16>, vector<128x128xbf16>, vector<8x128xf32> -> vector<8x128xf32>
    %133 = arith.subf %107, %111 : vector<8x128xf32>
    %134 = arith.mulf %6, %133 : vector<8x128xf32>
    %135 = arith.addf %125, %132 : vector<8x128xf32>
    %136 = arith.subf %135, %130 : vector<8x128xf32>
    %137 = arith.mulf %23, %136 : vector<8x128xf32>
    %138 = arith.addf %134, %137 : vector<8x128xf32>
    %cst_47 = arith.constant 1.000000e+00 : f32
    %139 = vector.broadcast %cst_47 : f32 to vector<8x128xf32>
    %140 = arith.cmpf ogt, %138, %139 : vector<8x128xf32>
    %141 = arith.extui %140 : vector<8x128xi1> to vector<8x128xi32>
    %142 = arith.sitofp %141 : vector<8x128xi32> to vector<8x128xf32>
    %c3_48 = arith.constant 3 : index
    %c0_49 = arith.constant 0 : index
    %c0_50 = arith.constant 0 : index
    %143 = vector.load %arg3[%c3_48, %c0_49, %c0_50] : memref<16x8x128xbf16, #tpu.memory_space<vmem>>, vector<1x8x128xbf16>
    %144 = vector.shape_cast %143 : vector<1x8x128xbf16> to vector<8x128xbf16>
    %145 = arith.extf %144 : vector<8x128xbf16> to vector<8x128xf32>
    %cst_51 = arith.constant 1.11111116 : f32
    %146 = vector.broadcast %cst_51 : f32 to vector<8x128xf32>
    %147 = arith.mulf %145, %146 : vector<8x128xf32>
    %148 = arith.mulf %142, %147 : vector<8x128xf32>
    %c3_52 = arith.constant 3 : index
    %c0_53 = arith.constant 0 : index
    %c0_54 = arith.constant 0 : index
    %149 = vector.load %arg9[%c3_52, %c0_53, %c0_54] : memref<16x8x128xf32, #tpu.memory_space<vmem>>, vector<1x8x128xf32>
    %150 = vector.shape_cast %149 : vector<1x8x128xf32> to vector<8x128xf32>
    %151 = vector.shape_cast %148 : vector<8x128xf32> to vector<1x8x128xf32>
    tpu.vector_store %arg9[%c3_52, %c0_53, %c0_54], %151 {strides = array<i32>} : memref<16x8x128xf32, #tpu.memory_space<vmem>>, vector<1x8x128xf32>,
    %c4 = arith.constant 4 : index
    %c0_55 = arith.constant 0 : index
    %c0_56 = arith.constant 0 : index
    %152 = vector.load %arg2[%c4, %c0_55, %c0_56] : memref<16x8x128xbf16, #tpu.memory_space<vmem>>, vector<1x8x128xbf16>
    %153 = vector.shape_cast %152 : vector<1x8x128xbf16> to vector<8x128xbf16>
    %154 = arith.extf %153 : vector<8x128xbf16> to vector<8x128xf32>
    %155 = arith.mulf %154, %18 : vector<8x128xf32>
    %156 = arith.addf %155, %21 : vector<8x128xf32>
    %157 = arith.mulf %9, %130 : vector<8x128xf32>
    %158 = arith.mulf %12, %138 : vector<8x128xf32>
    %159 = arith.addf %157, %158 : vector<8x128xf32>
    %160 = arith.mulf %15, %142 : vector<8x128xf32>
    %161 = arith.addf %159, %160 : vector<8x128xf32>
    %162 = arith.truncf %142 : vector<8x128xf32> to vector<8x128xbf16>
    %cst_57 = arith.constant dense<0.000000e+00> : vector<8x128xf32>
    %163 = tpu.matmul %162, %24, %cst_57 {dimension_numbers = #tpu.dot_dimension_numbers<[1], [0], [0], [1], [0, 0, 1, 1], [], []>} : vector<8x128xbf16>, vector<128x128xbf16>, vector<8x128xf32> -> vector<8x128xf32>
    %164 = arith.subf %138, %142 : vector<8x128xf32>
    %165 = arith.mulf %6, %164 : vector<8x128xf32>
    %166 = arith.addf %156, %163 : vector<8x128xf32>
    %167 = arith.subf %166, %161 : vector<8x128xf32>
    %168 = arith.mulf %23, %167 : vector<8x128xf32>
    %169 = arith.addf %165, %168 : vector<8x128xf32>
    %cst_58 = arith.constant 1.000000e+00 : f32
    %170 = vector.broadcast %cst_58 : f32 to vector<8x128xf32>
    %171 = arith.cmpf ogt, %169, %170 : vector<8x128xf32>
    %172 = arith.extui %171 : vector<8x128xi1> to vector<8x128xi32>
    %173 = arith.sitofp %172 : vector<8x128xi32> to vector<8x128xf32>
    %c4_59 = arith.constant 4 : index
    %c0_60 = arith.constant 0 : index
    %c0_61 = arith.constant 0 : index
    %174 = vector.load %arg3[%c4_59, %c0_60, %c0_61] : memref<16x8x128xbf16, #tpu.memory_space<vmem>>, vector<1x8x128xbf16>
    %175 = vector.shape_cast %174 : vector<1x8x128xbf16> to vector<8x128xbf16>
    %176 = arith.extf %175 : vector<8x128xbf16> to vector<8x128xf32>
    %cst_62 = arith.constant 1.11111116 : f32
    %177 = vector.broadcast %cst_62 : f32 to vector<8x128xf32>
    %178 = arith.mulf %176, %177 : vector<8x128xf32>
    %179 = arith.mulf %173, %178 : vector<8x128xf32>
    %c4_63 = arith.constant 4 : index
    %c0_64 = arith.constant 0 : index
    %c0_65 = arith.constant 0 : index
    %180 = vector.load %arg9[%c4_63, %c0_64, %c0_65] : memref<16x8x128xf32, #tpu.memory_space<vmem>>, vector<1x8x128xf32>
    %181 = vector.shape_cast %180 : vector<1x8x128xf32> to vector<8x128xf32>
    %182 = vector.shape_cast %179 : vector<8x128xf32> to vector<1x8x128xf32>
    tpu.vector_store %arg9[%c4_63, %c0_64, %c0_65], %182 {strides = array<i32>} : memref<16x8x128xf32, #tpu.memory_space<vmem>>, vector<1x8x128xf32>,
    %c5 = arith.constant 5 : index
    %c0_66 = arith.constant 0 : index
    %c0_67 = arith.constant 0 : index
    %183 = vector.load %arg2[%c5, %c0_66, %c0_67] : memref<16x8x128xbf16, #tpu.memory_space<vmem>>, vector<1x8x128xbf16>
    %184 = vector.shape_cast %183 : vector<1x8x128xbf16> to vector<8x128xbf16>
    %185 = arith.extf %184 : vector<8x128xbf16> to vector<8x128xf32>
    %186 = arith.mulf %185, %18 : vector<8x128xf32>
    %187 = arith.addf %186, %21 : vector<8x128xf32>
    %188 = arith.mulf %9, %161 : vector<8x128xf32>
    %189 = arith.mulf %12, %169 : vector<8x128xf32>
    %190 = arith.addf %188, %189 : vector<8x128xf32>
    %191 = arith.mulf %15, %173 : vector<8x128xf32>
    %192 = arith.addf %190, %191 : vector<8x128xf32>
    %193 = arith.truncf %173 : vector<8x128xf32> to vector<8x128xbf16>
    %cst_68 = arith.constant dense<0.000000e+00> : vector<8x128xf32>
    %194 = tpu.matmul %193, %24, %cst_68 {dimension_numbers = #tpu.dot_dimension_numbers<[1], [0], [0], [1], [0, 0, 1, 1], [], []>} : vector<8x128xbf16>, vector<128x128xbf16>, vector<8x128xf32> -> vector<8x128xf32>
    %195 = arith.subf %169, %173 : vector<8x128xf32>
    %196 = arith.mulf %6, %195 : vector<8x128xf32>
    %197 = arith.addf %187, %194 : vector<8x128xf32>
    %198 = arith.subf %197, %192 : vector<8x128xf32>
    %199 = arith.mulf %23, %198 : vector<8x128xf32>
    %200 = arith.addf %196, %199 : vector<8x128xf32>
    %cst_69 = arith.constant 1.000000e+00 : f32
    %201 = vector.broadcast %cst_69 : f32 to vector<8x128xf32>
    %202 = arith.cmpf ogt, %200, %201 : vector<8x128xf32>
    %203 = arith.extui %202 : vector<8x128xi1> to vector<8x128xi32>
    %204 = arith.sitofp %203 : vector<8x128xi32> to vector<8x128xf32>
    %c5_70 = arith.constant 5 : index
    %c0_71 = arith.constant 0 : index
    %c0_72 = arith.constant 0 : index
    %205 = vector.load %arg3[%c5_70, %c0_71, %c0_72] : memref<16x8x128xbf16, #tpu.memory_space<vmem>>, vector<1x8x128xbf16>
    %206 = vector.shape_cast %205 : vector<1x8x128xbf16> to vector<8x128xbf16>
    %207 = arith.extf %206 : vector<8x128xbf16> to vector<8x128xf32>
    %cst_73 = arith.constant 1.11111116 : f32
    %208 = vector.broadcast %cst_73 : f32 to vector<8x128xf32>
    %209 = arith.mulf %207, %208 : vector<8x128xf32>
    %210 = arith.mulf %204, %209 : vector<8x128xf32>
    %c5_74 = arith.constant 5 : index
    %c0_75 = arith.constant 0 : index
    %c0_76 = arith.constant 0 : index
    %211 = vector.load %arg9[%c5_74, %c0_75, %c0_76] : memref<16x8x128xf32, #tpu.memory_space<vmem>>, vector<1x8x128xf32>
    %212 = vector.shape_cast %211 : vector<1x8x128xf32> to vector<8x128xf32>
    %213 = vector.shape_cast %210 : vector<8x128xf32> to vector<1x8x128xf32>
    tpu.vector_store %arg9[%c5_74, %c0_75, %c0_76], %213 {strides = array<i32>} : memref<16x8x128xf32, #tpu.memory_space<vmem>>, vector<1x8x128xf32>,
    %c6 = arith.constant 6 : index
    %c0_77 = arith.constant 0 : index
    %c0_78 = arith.constant 0 : index
    %214 = vector.load %arg2[%c6, %c0_77, %c0_78] : memref<16x8x128xbf16, #tpu.memory_space<vmem>>, vector<1x8x128xbf16>
    %215 = vector.shape_cast %214 : vector<1x8x128xbf16> to vector<8x128xbf16>
    %216 = arith.extf %215 : vector<8x128xbf16> to vector<8x128xf32>
    %217 = arith.mulf %216, %18 : vector<8x128xf32>
    %218 = arith.addf %217, %21 : vector<8x128xf32>
    %219 = arith.mulf %9, %192 : vector<8x128xf32>
    %220 = arith.mulf %12, %200 : vector<8x128xf32>
    %221 = arith.addf %219, %220 : vector<8x128xf32>
    %222 = arith.mulf %15, %204 : vector<8x128xf32>
    %223 = arith.addf %221, %222 : vector<8x128xf32>
    %224 = arith.truncf %204 : vector<8x128xf32> to vector<8x128xbf16>
    %cst_79 = arith.constant dense<0.000000e+00> : vector<8x128xf32>
    %225 = tpu.matmul %224, %24, %cst_79 {dimension_numbers = #tpu.dot_dimension_numbers<[1], [0], [0], [1], [0, 0, 1, 1], [], []>} : vector<8x128xbf16>, vector<128x128xbf16>, vector<8x128xf32> -> vector<8x128xf32>
    %226 = arith.subf %200, %204 : vector<8x128xf32>
    %227 = arith.mulf %6, %226 : vector<8x128xf32>
    %228 = arith.addf %218, %225 : vector<8x128xf32>
    %229 = arith.subf %228, %223 : vector<8x128xf32>
    %230 = arith.mulf %23, %229 : vector<8x128xf32>
    %231 = arith.addf %227, %230 : vector<8x128xf32>
    %cst_80 = arith.constant 1.000000e+00 : f32
    %232 = vector.broadcast %cst_80 : f32 to vector<8x128xf32>
    %233 = arith.cmpf ogt, %231, %232 : vector<8x128xf32>
    %234 = arith.extui %233 : vector<8x128xi1> to vector<8x128xi32>
    %235 = arith.sitofp %234 : vector<8x128xi32> to vector<8x128xf32>
    %c6_81 = arith.constant 6 : index
    %c0_82 = arith.constant 0 : index
    %c0_83 = arith.constant 0 : index
    %236 = vector.load %arg3[%c6_81, %c0_82, %c0_83] : memref<16x8x128xbf16, #tpu.memory_space<vmem>>, vector<1x8x128xbf16>
    %237 = vector.shape_cast %236 : vector<1x8x128xbf16> to vector<8x128xbf16>
    %238 = arith.extf %237 : vector<8x128xbf16> to vector<8x128xf32>
    %cst_84 = arith.constant 1.11111116 : f32
    %239 = vector.broadcast %cst_84 : f32 to vector<8x128xf32>
    %240 = arith.mulf %238, %239 : vector<8x128xf32>
    %241 = arith.mulf %235, %240 : vector<8x128xf32>
    %c6_85 = arith.constant 6 : index
    %c0_86 = arith.constant 0 : index
    %c0_87 = arith.constant 0 : index
    %242 = vector.load %arg9[%c6_85, %c0_86, %c0_87] : memref<16x8x128xf32, #tpu.memory_space<vmem>>, vector<1x8x128xf32>
    %243 = vector.shape_cast %242 : vector<1x8x128xf32> to vector<8x128xf32>
    %244 = vector.shape_cast %241 : vector<8x128xf32> to vector<1x8x128xf32>
    tpu.vector_store %arg9[%c6_85, %c0_86, %c0_87], %244 {strides = array<i32>} : memref<16x8x128xf32, #tpu.memory_space<vmem>>, vector<1x8x128xf32>,
    %c7 = arith.constant 7 : index
    %c0_88 = arith.constant 0 : index
    %c0_89 = arith.constant 0 : index
    %245 = vector.load %arg2[%c7, %c0_88, %c0_89] : memref<16x8x128xbf16, #tpu.memory_space<vmem>>, vector<1x8x128xbf16>
    %246 = vector.shape_cast %245 : vector<1x8x128xbf16> to vector<8x128xbf16>
    %247 = arith.extf %246 : vector<8x128xbf16> to vector<8x128xf32>
    %248 = arith.mulf %247, %18 : vector<8x128xf32>
    %249 = arith.addf %248, %21 : vector<8x128xf32>
    %250 = arith.mulf %9, %223 : vector<8x128xf32>
    %251 = arith.mulf %12, %231 : vector<8x128xf32>
    %252 = arith.addf %250, %251 : vector<8x128xf32>
    %253 = arith.mulf %15, %235 : vector<8x128xf32>
    %254 = arith.addf %252, %253 : vector<8x128xf32>
    %255 = arith.truncf %235 : vector<8x128xf32> to vector<8x128xbf16>
    %cst_90 = arith.constant dense<0.000000e+00> : vector<8x128xf32>
    %256 = tpu.matmul %255, %24, %cst_90 {dimension_numbers = #tpu.dot_dimension_numbers<[1], [0], [0], [1], [0, 0, 1, 1], [], []>} : vector<8x128xbf16>, vector<128x128xbf16>, vector<8x128xf32> -> vector<8x128xf32>
    %257 = arith.subf %231, %235 : vector<8x128xf32>
    %258 = arith.mulf %6, %257 : vector<8x128xf32>
    %259 = arith.addf %249, %256 : vector<8x128xf32>
    %260 = arith.subf %259, %254 : vector<8x128xf32>
    %261 = arith.mulf %23, %260 : vector<8x128xf32>
    %262 = arith.addf %258, %261 : vector<8x128xf32>
    %cst_91 = arith.constant 1.000000e+00 : f32
    %263 = vector.broadcast %cst_91 : f32 to vector<8x128xf32>
    %264 = arith.cmpf ogt, %262, %263 : vector<8x128xf32>
    %265 = arith.extui %264 : vector<8x128xi1> to vector<8x128xi32>
    %266 = arith.sitofp %265 : vector<8x128xi32> to vector<8x128xf32>
    %c7_92 = arith.constant 7 : index
    %c0_93 = arith.constant 0 : index
    %c0_94 = arith.constant 0 : index
    %267 = vector.load %arg3[%c7_92, %c0_93, %c0_94] : memref<16x8x128xbf16, #tpu.memory_space<vmem>>, vector<1x8x128xbf16>
    %268 = vector.shape_cast %267 : vector<1x8x128xbf16> to vector<8x128xbf16>
    %269 = arith.extf %268 : vector<8x128xbf16> to vector<8x128xf32>
    %cst_95 = arith.constant 1.11111116 : f32
    %270 = vector.broadcast %cst_95 : f32 to vector<8x128xf32>
    %271 = arith.mulf %269, %270 : vector<8x128xf32>
    %272 = arith.mulf %266, %271 : vector<8x128xf32>
    %c7_96 = arith.constant 7 : index
    %c0_97 = arith.constant 0 : index
    %c0_98 = arith.constant 0 : index
    %273 = vector.load %arg9[%c7_96, %c0_97, %c0_98] : memref<16x8x128xf32, #tpu.memory_space<vmem>>, vector<1x8x128xf32>
    %274 = vector.shape_cast %273 : vector<1x8x128xf32> to vector<8x128xf32>
    %275 = vector.shape_cast %272 : vector<8x128xf32> to vector<1x8x128xf32>
    tpu.vector_store %arg9[%c7_96, %c0_97, %c0_98], %275 {strides = array<i32>} : memref<16x8x128xf32, #tpu.memory_space<vmem>>, vector<1x8x128xf32>,
    %c8 = arith.constant 8 : index
    %c0_99 = arith.constant 0 : index
    %c0_100 = arith.constant 0 : index
    %276 = vector.load %arg2[%c8, %c0_99, %c0_100] : memref<16x8x128xbf16, #tpu.memory_space<vmem>>, vector<1x8x128xbf16>
    %277 = vector.shape_cast %276 : vector<1x8x128xbf16> to vector<8x128xbf16>
    %278 = arith.extf %277 : vector<8x128xbf16> to vector<8x128xf32>
    %279 = arith.mulf %278, %18 : vector<8x128xf32>
    %280 = arith.addf %279, %21 : vector<8x128xf32>
    %281 = arith.mulf %9, %254 : vector<8x128xf32>
    %282 = arith.mulf %12, %262 : vector<8x128xf32>
    %283 = arith.addf %281, %282 : vector<8x128xf32>
    %284 = arith.mulf %15, %266 : vector<8x128xf32>
    %285 = arith.addf %283, %284 : vector<8x128xf32>
    %286 = arith.truncf %266 : vector<8x128xf32> to vector<8x128xbf16>
    %cst_101 = arith.constant dense<0.000000e+00> : vector<8x128xf32>
    %287 = tpu.matmul %286, %24, %cst_101 {dimension_numbers = #tpu.dot_dimension_numbers<[1], [0], [0], [1], [0, 0, 1, 1], [], []>} : vector<8x128xbf16>, vector<128x128xbf16>, vector<8x128xf32> -> vector<8x128xf32>
    %288 = arith.subf %262, %266 : vector<8x128xf32>
    %289 = arith.mulf %6, %288 : vector<8x128xf32>
    %290 = arith.addf %280, %287 : vector<8x128xf32>
    %291 = arith.subf %290, %285 : vector<8x128xf32>
    %292 = arith.mulf %23, %291 : vector<8x128xf32>
    %293 = arith.addf %289, %292 : vector<8x128xf32>
    %cst_102 = arith.constant 1.000000e+00 : f32
    %294 = vector.broadcast %cst_102 : f32 to vector<8x128xf32>
    %295 = arith.cmpf ogt, %293, %294 : vector<8x128xf32>
    %296 = arith.extui %295 : vector<8x128xi1> to vector<8x128xi32>
    %297 = arith.sitofp %296 : vector<8x128xi32> to vector<8x128xf32>
    %c8_103 = arith.constant 8 : index
    %c0_104 = arith.constant 0 : index
    %c0_105 = arith.constant 0 : index
    %298 = vector.load %arg3[%c8_103, %c0_104, %c0_105] : memref<16x8x128xbf16, #tpu.memory_space<vmem>>, vector<1x8x128xbf16>
    %299 = vector.shape_cast %298 : vector<1x8x128xbf16> to vector<8x128xbf16>
    %300 = arith.extf %299 : vector<8x128xbf16> to vector<8x128xf32>
    %cst_106 = arith.constant 1.11111116 : f32
    %301 = vector.broadcast %cst_106 : f32 to vector<8x128xf32>
    %302 = arith.mulf %300, %301 : vector<8x128xf32>
    %303 = arith.mulf %297, %302 : vector<8x128xf32>
    %c8_107 = arith.constant 8 : index
    %c0_108 = arith.constant 0 : index
    %c0_109 = arith.constant 0 : index
    %304 = vector.load %arg9[%c8_107, %c0_108, %c0_109] : memref<16x8x128xf32, #tpu.memory_space<vmem>>, vector<1x8x128xf32>
    %305 = vector.shape_cast %304 : vector<1x8x128xf32> to vector<8x128xf32>
    %306 = vector.shape_cast %303 : vector<8x128xf32> to vector<1x8x128xf32>
    tpu.vector_store %arg9[%c8_107, %c0_108, %c0_109], %306 {strides = array<i32>} : memref<16x8x128xf32, #tpu.memory_space<vmem>>, vector<1x8x128xf32>,
    %c9 = arith.constant 9 : index
    %c0_110 = arith.constant 0 : index
    %c0_111 = arith.constant 0 : index
    %307 = vector.load %arg2[%c9, %c0_110, %c0_111] : memref<16x8x128xbf16, #tpu.memory_space<vmem>>, vector<1x8x128xbf16>
    %308 = vector.shape_cast %307 : vector<1x8x128xbf16> to vector<8x128xbf16>
    %309 = arith.extf %308 : vector<8x128xbf16> to vector<8x128xf32>
    %310 = arith.mulf %309, %18 : vector<8x128xf32>
    %311 = arith.addf %310, %21 : vector<8x128xf32>
    %312 = arith.mulf %9, %285 : vector<8x128xf32>
    %313 = arith.mulf %12, %293 : vector<8x128xf32>
    %314 = arith.addf %312, %313 : vector<8x128xf32>
    %315 = arith.mulf %15, %297 : vector<8x128xf32>
    %316 = arith.addf %314, %315 : vector<8x128xf32>
    %317 = arith.truncf %297 : vector<8x128xf32> to vector<8x128xbf16>
    %cst_112 = arith.constant dense<0.000000e+00> : vector<8x128xf32>
    %318 = tpu.matmul %317, %24, %cst_112 {dimension_numbers = #tpu.dot_dimension_numbers<[1], [0], [0], [1], [0, 0, 1, 1], [], []>} : vector<8x128xbf16>, vector<128x128xbf16>, vector<8x128xf32> -> vector<8x128xf32>
    %319 = arith.subf %293, %297 : vector<8x128xf32>
    %320 = arith.mulf %6, %319 : vector<8x128xf32>
    %321 = arith.addf %311, %318 : vector<8x128xf32>
    %322 = arith.subf %321, %316 : vector<8x128xf32>
    %323 = arith.mulf %23, %322 : vector<8x128xf32>
    %324 = arith.addf %320, %323 : vector<8x128xf32>
    %cst_113 = arith.constant 1.000000e+00 : f32
    %325 = vector.broadcast %cst_113 : f32 to vector<8x128xf32>
    %326 = arith.cmpf ogt, %324, %325 : vector<8x128xf32>
    %327 = arith.extui %326 : vector<8x128xi1> to vector<8x128xi32>
    %328 = arith.sitofp %327 : vector<8x128xi32> to vector<8x128xf32>
    %c9_114 = arith.constant 9 : index
    %c0_115 = arith.constant 0 : index
    %c0_116 = arith.constant 0 : index
    %329 = vector.load %arg3[%c9_114, %c0_115, %c0_116] : memref<16x8x128xbf16, #tpu.memory_space<vmem>>, vector<1x8x128xbf16>
    %330 = vector.shape_cast %329 : vector<1x8x128xbf16> to vector<8x128xbf16>
    %331 = arith.extf %330 : vector<8x128xbf16> to vector<8x128xf32>
    %cst_117 = arith.constant 1.11111116 : f32
    %332 = vector.broadcast %cst_117 : f32 to vector<8x128xf32>
    %333 = arith.mulf %331, %332 : vector<8x128xf32>
    %334 = arith.mulf %328, %333 : vector<8x128xf32>
    %c9_118 = arith.constant 9 : index
    %c0_119 = arith.constant 0 : index
    %c0_120 = arith.constant 0 : index
    %335 = vector.load %arg9[%c9_118, %c0_119, %c0_120] : memref<16x8x128xf32, #tpu.memory_space<vmem>>, vector<1x8x128xf32>
    %336 = vector.shape_cast %335 : vector<1x8x128xf32> to vector<8x128xf32>
    %337 = vector.shape_cast %334 : vector<8x128xf32> to vector<1x8x128xf32>
    tpu.vector_store %arg9[%c9_118, %c0_119, %c0_120], %337 {strides = array<i32>} : memref<16x8x128xf32, #tpu.memory_space<vmem>>, vector<1x8x128xf32>,
    %c10 = arith.constant 10 : index
    %c0_121 = arith.constant 0 : index
    %c0_122 = arith.constant 0 : index
    %338 = vector.load %arg2[%c10, %c0_121, %c0_122] : memref<16x8x128xbf16, #tpu.memory_space<vmem>>, vector<1x8x128xbf16>
    %339 = vector.shape_cast %338 : vector<1x8x128xbf16> to vector<8x128xbf16>
    %340 = arith.extf %339 : vector<8x128xbf16> to vector<8x128xf32>
    %341 = arith.mulf %340, %18 : vector<8x128xf32>
    %342 = arith.addf %341, %21 : vector<8x128xf32>
    %343 = arith.mulf %9, %316 : vector<8x128xf32>
    %344 = arith.mulf %12, %324 : vector<8x128xf32>
    %345 = arith.addf %343, %344 : vector<8x128xf32>
    %346 = arith.mulf %15, %328 : vector<8x128xf32>
    %347 = arith.addf %345, %346 : vector<8x128xf32>
    %348 = arith.truncf %328 : vector<8x128xf32> to vector<8x128xbf16>
    %cst_123 = arith.constant dense<0.000000e+00> : vector<8x128xf32>
    %349 = tpu.matmul %348, %24, %cst_123 {dimension_numbers = #tpu.dot_dimension_numbers<[1], [0], [0], [1], [0, 0, 1, 1], [], []>} : vector<8x128xbf16>, vector<128x128xbf16>, vector<8x128xf32> -> vector<8x128xf32>
    %350 = arith.subf %324, %328 : vector<8x128xf32>
    %351 = arith.mulf %6, %350 : vector<8x128xf32>
    %352 = arith.addf %342, %349 : vector<8x128xf32>
    %353 = arith.subf %352, %347 : vector<8x128xf32>
    %354 = arith.mulf %23, %353 : vector<8x128xf32>
    %355 = arith.addf %351, %354 : vector<8x128xf32>
    %cst_124 = arith.constant 1.000000e+00 : f32
    %356 = vector.broadcast %cst_124 : f32 to vector<8x128xf32>
    %357 = arith.cmpf ogt, %355, %356 : vector<8x128xf32>
    %358 = arith.extui %357 : vector<8x128xi1> to vector<8x128xi32>
    %359 = arith.sitofp %358 : vector<8x128xi32> to vector<8x128xf32>
    %c10_125 = arith.constant 10 : index
    %c0_126 = arith.constant 0 : index
    %c0_127 = arith.constant 0 : index
    %360 = vector.load %arg3[%c10_125, %c0_126, %c0_127] : memref<16x8x128xbf16, #tpu.memory_space<vmem>>, vector<1x8x128xbf16>
    %361 = vector.shape_cast %360 : vector<1x8x128xbf16> to vector<8x128xbf16>
    %362 = arith.extf %361 : vector<8x128xbf16> to vector<8x128xf32>
    %cst_128 = arith.constant 1.11111116 : f32
    %363 = vector.broadcast %cst_128 : f32 to vector<8x128xf32>
    %364 = arith.mulf %362, %363 : vector<8x128xf32>
    %365 = arith.mulf %359, %364 : vector<8x128xf32>
    %c10_129 = arith.constant 10 : index
    %c0_130 = arith.constant 0 : index
    %c0_131 = arith.constant 0 : index
    %366 = vector.load %arg9[%c10_129, %c0_130, %c0_131] : memref<16x8x128xf32, #tpu.memory_space<vmem>>, vector<1x8x128xf32>
    %367 = vector.shape_cast %366 : vector<1x8x128xf32> to vector<8x128xf32>
    %368 = vector.shape_cast %365 : vector<8x128xf32> to vector<1x8x128xf32>
    tpu.vector_store %arg9[%c10_129, %c0_130, %c0_131], %368 {strides = array<i32>} : memref<16x8x128xf32, #tpu.memory_space<vmem>>, vector<1x8x128xf32>,
    %c11 = arith.constant 11 : index
    %c0_132 = arith.constant 0 : index
    %c0_133 = arith.constant 0 : index
    %369 = vector.load %arg2[%c11, %c0_132, %c0_133] : memref<16x8x128xbf16, #tpu.memory_space<vmem>>, vector<1x8x128xbf16>
    %370 = vector.shape_cast %369 : vector<1x8x128xbf16> to vector<8x128xbf16>
    %371 = arith.extf %370 : vector<8x128xbf16> to vector<8x128xf32>
    %372 = arith.mulf %371, %18 : vector<8x128xf32>
    %373 = arith.addf %372, %21 : vector<8x128xf32>
    %374 = arith.mulf %9, %347 : vector<8x128xf32>
    %375 = arith.mulf %12, %355 : vector<8x128xf32>
    %376 = arith.addf %374, %375 : vector<8x128xf32>
    %377 = arith.mulf %15, %359 : vector<8x128xf32>
    %378 = arith.addf %376, %377 : vector<8x128xf32>
    %379 = arith.truncf %359 : vector<8x128xf32> to vector<8x128xbf16>
    %cst_134 = arith.constant dense<0.000000e+00> : vector<8x128xf32>
    %380 = tpu.matmul %379, %24, %cst_134 {dimension_numbers = #tpu.dot_dimension_numbers<[1], [0], [0], [1], [0, 0, 1, 1], [], []>} : vector<8x128xbf16>, vector<128x128xbf16>, vector<8x128xf32> -> vector<8x128xf32>
    %381 = arith.subf %355, %359 : vector<8x128xf32>
    %382 = arith.mulf %6, %381 : vector<8x128xf32>
    %383 = arith.addf %373, %380 : vector<8x128xf32>
    %384 = arith.subf %383, %378 : vector<8x128xf32>
    %385 = arith.mulf %23, %384 : vector<8x128xf32>
    %386 = arith.addf %382, %385 : vector<8x128xf32>
    %cst_135 = arith.constant 1.000000e+00 : f32
    %387 = vector.broadcast %cst_135 : f32 to vector<8x128xf32>
    %388 = arith.cmpf ogt, %386, %387 : vector<8x128xf32>
    %389 = arith.extui %388 : vector<8x128xi1> to vector<8x128xi32>
    %390 = arith.sitofp %389 : vector<8x128xi32> to vector<8x128xf32>
    %c11_136 = arith.constant 11 : index
    %c0_137 = arith.constant 0 : index
    %c0_138 = arith.constant 0 : index
    %391 = vector.load %arg3[%c11_136, %c0_137, %c0_138] : memref<16x8x128xbf16, #tpu.memory_space<vmem>>, vector<1x8x128xbf16>
    %392 = vector.shape_cast %391 : vector<1x8x128xbf16> to vector<8x128xbf16>
    %393 = arith.extf %392 : vector<8x128xbf16> to vector<8x128xf32>
    %cst_139 = arith.constant 1.11111116 : f32
    %394 = vector.broadcast %cst_139 : f32 to vector<8x128xf32>
    %395 = arith.mulf %393, %394 : vector<8x128xf32>
    %396 = arith.mulf %390, %395 : vector<8x128xf32>
    %c11_140 = arith.constant 11 : index
    %c0_141 = arith.constant 0 : index
    %c0_142 = arith.constant 0 : index
    %397 = vector.load %arg9[%c11_140, %c0_141, %c0_142] : memref<16x8x128xf32, #tpu.memory_space<vmem>>, vector<1x8x128xf32>
    %398 = vector.shape_cast %397 : vector<1x8x128xf32> to vector<8x128xf32>
    %399 = vector.shape_cast %396 : vector<8x128xf32> to vector<1x8x128xf32>
    tpu.vector_store %arg9[%c11_140, %c0_141, %c0_142], %399 {strides = array<i32>} : memref<16x8x128xf32, #tpu.memory_space<vmem>>, vector<1x8x128xf32>,
    %c12 = arith.constant 12 : index
    %c0_143 = arith.constant 0 : index
    %c0_144 = arith.constant 0 : index
    %400 = vector.load %arg2[%c12, %c0_143, %c0_144] : memref<16x8x128xbf16, #tpu.memory_space<vmem>>, vector<1x8x128xbf16>
    %401 = vector.shape_cast %400 : vector<1x8x128xbf16> to vector<8x128xbf16>
    %402 = arith.extf %401 : vector<8x128xbf16> to vector<8x128xf32>
    %403 = arith.mulf %402, %18 : vector<8x128xf32>
    %404 = arith.addf %403, %21 : vector<8x128xf32>
    %405 = arith.mulf %9, %378 : vector<8x128xf32>
    %406 = arith.mulf %12, %386 : vector<8x128xf32>
    %407 = arith.addf %405, %406 : vector<8x128xf32>
    %408 = arith.mulf %15, %390 : vector<8x128xf32>
    %409 = arith.addf %407, %408 : vector<8x128xf32>
    %410 = arith.truncf %390 : vector<8x128xf32> to vector<8x128xbf16>
    %cst_145 = arith.constant dense<0.000000e+00> : vector<8x128xf32>
    %411 = tpu.matmul %410, %24, %cst_145 {dimension_numbers = #tpu.dot_dimension_numbers<[1], [0], [0], [1], [0, 0, 1, 1], [], []>} : vector<8x128xbf16>, vector<128x128xbf16>, vector<8x128xf32> -> vector<8x128xf32>
    %412 = arith.subf %386, %390 : vector<8x128xf32>
    %413 = arith.mulf %6, %412 : vector<8x128xf32>
    %414 = arith.addf %404, %411 : vector<8x128xf32>
    %415 = arith.subf %414, %409 : vector<8x128xf32>
    %416 = arith.mulf %23, %415 : vector<8x128xf32>
    %417 = arith.addf %413, %416 : vector<8x128xf32>
    %cst_146 = arith.constant 1.000000e+00 : f32
    %418 = vector.broadcast %cst_146 : f32 to vector<8x128xf32>
    %419 = arith.cmpf ogt, %417, %418 : vector<8x128xf32>
    %420 = arith.extui %419 : vector<8x128xi1> to vector<8x128xi32>
    %421 = arith.sitofp %420 : vector<8x128xi32> to vector<8x128xf32>
    %c12_147 = arith.constant 12 : index
    %c0_148 = arith.constant 0 : index
    %c0_149 = arith.constant 0 : index
    %422 = vector.load %arg3[%c12_147, %c0_148, %c0_149] : memref<16x8x128xbf16, #tpu.memory_space<vmem>>, vector<1x8x128xbf16>
    %423 = vector.shape_cast %422 : vector<1x8x128xbf16> to vector<8x128xbf16>
    %424 = arith.extf %423 : vector<8x128xbf16> to vector<8x128xf32>
    %cst_150 = arith.constant 1.11111116 : f32
    %425 = vector.broadcast %cst_150 : f32 to vector<8x128xf32>
    %426 = arith.mulf %424, %425 : vector<8x128xf32>
    %427 = arith.mulf %421, %426 : vector<8x128xf32>
    %c12_151 = arith.constant 12 : index
    %c0_152 = arith.constant 0 : index
    %c0_153 = arith.constant 0 : index
    %428 = vector.load %arg9[%c12_151, %c0_152, %c0_153] : memref<16x8x128xf32, #tpu.memory_space<vmem>>, vector<1x8x128xf32>
    %429 = vector.shape_cast %428 : vector<1x8x128xf32> to vector<8x128xf32>
    %430 = vector.shape_cast %427 : vector<8x128xf32> to vector<1x8x128xf32>
    tpu.vector_store %arg9[%c12_151, %c0_152, %c0_153], %430 {strides = array<i32>} : memref<16x8x128xf32, #tpu.memory_space<vmem>>, vector<1x8x128xf32>,
    %c13 = arith.constant 13 : index
    %c0_154 = arith.constant 0 : index
    %c0_155 = arith.constant 0 : index
    %431 = vector.load %arg2[%c13, %c0_154, %c0_155] : memref<16x8x128xbf16, #tpu.memory_space<vmem>>, vector<1x8x128xbf16>
    %432 = vector.shape_cast %431 : vector<1x8x128xbf16> to vector<8x128xbf16>
    %433 = arith.extf %432 : vector<8x128xbf16> to vector<8x128xf32>
    %434 = arith.mulf %433, %18 : vector<8x128xf32>
    %435 = arith.addf %434, %21 : vector<8x128xf32>
    %436 = arith.mulf %9, %409 : vector<8x128xf32>
    %437 = arith.mulf %12, %417 : vector<8x128xf32>
    %438 = arith.addf %436, %437 : vector<8x128xf32>
    %439 = arith.mulf %15, %421 : vector<8x128xf32>
    %440 = arith.addf %438, %439 : vector<8x128xf32>
    %441 = arith.truncf %421 : vector<8x128xf32> to vector<8x128xbf16>
    %cst_156 = arith.constant dense<0.000000e+00> : vector<8x128xf32>
    %442 = tpu.matmul %441, %24, %cst_156 {dimension_numbers = #tpu.dot_dimension_numbers<[1], [0], [0], [1], [0, 0, 1, 1], [], []>} : vector<8x128xbf16>, vector<128x128xbf16>, vector<8x128xf32> -> vector<8x128xf32>
    %443 = arith.subf %417, %421 : vector<8x128xf32>
    %444 = arith.mulf %6, %443 : vector<8x128xf32>
    %445 = arith.addf %435, %442 : vector<8x128xf32>
    %446 = arith.subf %445, %440 : vector<8x128xf32>
    %447 = arith.mulf %23, %446 : vector<8x128xf32>
    %448 = arith.addf %444, %447 : vector<8x128xf32>
    %cst_157 = arith.constant 1.000000e+00 : f32
    %449 = vector.broadcast %cst_157 : f32 to vector<8x128xf32>
    %450 = arith.cmpf ogt, %448, %449 : vector<8x128xf32>
    %451 = arith.extui %450 : vector<8x128xi1> to vector<8x128xi32>
    %452 = arith.sitofp %451 : vector<8x128xi32> to vector<8x128xf32>
    %c13_158 = arith.constant 13 : index
    %c0_159 = arith.constant 0 : index
    %c0_160 = arith.constant 0 : index
    %453 = vector.load %arg3[%c13_158, %c0_159, %c0_160] : memref<16x8x128xbf16, #tpu.memory_space<vmem>>, vector<1x8x128xbf16>
    %454 = vector.shape_cast %453 : vector<1x8x128xbf16> to vector<8x128xbf16>
    %455 = arith.extf %454 : vector<8x128xbf16> to vector<8x128xf32>
    %cst_161 = arith.constant 1.11111116 : f32
    %456 = vector.broadcast %cst_161 : f32 to vector<8x128xf32>
    %457 = arith.mulf %455, %456 : vector<8x128xf32>
    %458 = arith.mulf %452, %457 : vector<8x128xf32>
    %c13_162 = arith.constant 13 : index
    %c0_163 = arith.constant 0 : index
    %c0_164 = arith.constant 0 : index
    %459 = vector.load %arg9[%c13_162, %c0_163, %c0_164] : memref<16x8x128xf32, #tpu.memory_space<vmem>>, vector<1x8x128xf32>
    %460 = vector.shape_cast %459 : vector<1x8x128xf32> to vector<8x128xf32>
    %461 = vector.shape_cast %458 : vector<8x128xf32> to vector<1x8x128xf32>
    tpu.vector_store %arg9[%c13_162, %c0_163, %c0_164], %461 {strides = array<i32>} : memref<16x8x128xf32, #tpu.memory_space<vmem>>, vector<1x8x128xf32>,
    %c14 = arith.constant 14 : index
    %c0_165 = arith.constant 0 : index
    %c0_166 = arith.constant 0 : index
    %462 = vector.load %arg2[%c14, %c0_165, %c0_166] : memref<16x8x128xbf16, #tpu.memory_space<vmem>>, vector<1x8x128xbf16>
    %463 = vector.shape_cast %462 : vector<1x8x128xbf16> to vector<8x128xbf16>
    %464 = arith.extf %463 : vector<8x128xbf16> to vector<8x128xf32>
    %465 = arith.mulf %464, %18 : vector<8x128xf32>
    %466 = arith.addf %465, %21 : vector<8x128xf32>
    %467 = arith.mulf %9, %440 : vector<8x128xf32>
    %468 = arith.mulf %12, %448 : vector<8x128xf32>
    %469 = arith.addf %467, %468 : vector<8x128xf32>
    %470 = arith.mulf %15, %452 : vector<8x128xf32>
    %471 = arith.addf %469, %470 : vector<8x128xf32>
    %472 = arith.truncf %452 : vector<8x128xf32> to vector<8x128xbf16>
    %cst_167 = arith.constant dense<0.000000e+00> : vector<8x128xf32>
    %473 = tpu.matmul %472, %24, %cst_167 {dimension_numbers = #tpu.dot_dimension_numbers<[1], [0], [0], [1], [0, 0, 1, 1], [], []>} : vector<8x128xbf16>, vector<128x128xbf16>, vector<8x128xf32> -> vector<8x128xf32>
    %474 = arith.subf %448, %452 : vector<8x128xf32>
    %475 = arith.mulf %6, %474 : vector<8x128xf32>
    %476 = arith.addf %466, %473 : vector<8x128xf32>
    %477 = arith.subf %476, %471 : vector<8x128xf32>
    %478 = arith.mulf %23, %477 : vector<8x128xf32>
    %479 = arith.addf %475, %478 : vector<8x128xf32>
    %cst_168 = arith.constant 1.000000e+00 : f32
    %480 = vector.broadcast %cst_168 : f32 to vector<8x128xf32>
    %481 = arith.cmpf ogt, %479, %480 : vector<8x128xf32>
    %482 = arith.extui %481 : vector<8x128xi1> to vector<8x128xi32>
    %483 = arith.sitofp %482 : vector<8x128xi32> to vector<8x128xf32>
    %c14_169 = arith.constant 14 : index
    %c0_170 = arith.constant 0 : index
    %c0_171 = arith.constant 0 : index
    %484 = vector.load %arg3[%c14_169, %c0_170, %c0_171] : memref<16x8x128xbf16, #tpu.memory_space<vmem>>, vector<1x8x128xbf16>
    %485 = vector.shape_cast %484 : vector<1x8x128xbf16> to vector<8x128xbf16>
    %486 = arith.extf %485 : vector<8x128xbf16> to vector<8x128xf32>
    %cst_172 = arith.constant 1.11111116 : f32
    %487 = vector.broadcast %cst_172 : f32 to vector<8x128xf32>
    %488 = arith.mulf %486, %487 : vector<8x128xf32>
    %489 = arith.mulf %483, %488 : vector<8x128xf32>
    %c14_173 = arith.constant 14 : index
    %c0_174 = arith.constant 0 : index
    %c0_175 = arith.constant 0 : index
    %490 = vector.load %arg9[%c14_173, %c0_174, %c0_175] : memref<16x8x128xf32, #tpu.memory_space<vmem>>, vector<1x8x128xf32>
    %491 = vector.shape_cast %490 : vector<1x8x128xf32> to vector<8x128xf32>
    %492 = vector.shape_cast %489 : vector<8x128xf32> to vector<1x8x128xf32>
    tpu.vector_store %arg9[%c14_173, %c0_174, %c0_175], %492 {strides = array<i32>} : memref<16x8x128xf32, #tpu.memory_space<vmem>>, vector<1x8x128xf32>,
    %c15 = arith.constant 15 : index
    %c0_176 = arith.constant 0 : index
    %c0_177 = arith.constant 0 : index
    %493 = vector.load %arg2[%c15, %c0_176, %c0_177] : memref<16x8x128xbf16, #tpu.memory_space<vmem>>, vector<1x8x128xbf16>
    %494 = vector.shape_cast %493 : vector<1x8x128xbf16> to vector<8x128xbf16>
    %495 = arith.extf %494 : vector<8x128xbf16> to vector<8x128xf32>
    %496 = arith.mulf %495, %18 : vector<8x128xf32>
    %497 = arith.addf %496, %21 : vector<8x128xf32>
    %498 = arith.mulf %9, %471 : vector<8x128xf32>
    %499 = arith.mulf %12, %479 : vector<8x128xf32>
    %500 = arith.addf %498, %499 : vector<8x128xf32>
    %501 = arith.mulf %15, %483 : vector<8x128xf32>
    %502 = arith.addf %500, %501 : vector<8x128xf32>
    %503 = arith.truncf %483 : vector<8x128xf32> to vector<8x128xbf16>
    %cst_178 = arith.constant dense<0.000000e+00> : vector<8x128xf32>
    %504 = tpu.matmul %503, %24, %cst_178 {dimension_numbers = #tpu.dot_dimension_numbers<[1], [0], [0], [1], [0, 0, 1, 1], [], []>} : vector<8x128xbf16>, vector<128x128xbf16>, vector<8x128xf32> -> vector<8x128xf32>
    %505 = arith.subf %479, %483 : vector<8x128xf32>
    %506 = arith.mulf %6, %505 : vector<8x128xf32>
    %507 = arith.addf %497, %504 : vector<8x128xf32>
    %508 = arith.subf %507, %502 : vector<8x128xf32>
    %509 = arith.mulf %23, %508 : vector<8x128xf32>
    %510 = arith.addf %506, %509 : vector<8x128xf32>
    %cst_179 = arith.constant 1.000000e+00 : f32
    %511 = vector.broadcast %cst_179 : f32 to vector<8x128xf32>
    %512 = arith.cmpf ogt, %510, %511 : vector<8x128xf32>
    %513 = arith.extui %512 : vector<8x128xi1> to vector<8x128xi32>
    %514 = arith.sitofp %513 : vector<8x128xi32> to vector<8x128xf32>
    %c15_180 = arith.constant 15 : index
    %c0_181 = arith.constant 0 : index
    %c0_182 = arith.constant 0 : index
    %515 = vector.load %arg3[%c15_180, %c0_181, %c0_182] : memref<16x8x128xbf16, #tpu.memory_space<vmem>>, vector<1x8x128xbf16>
    %516 = vector.shape_cast %515 : vector<1x8x128xbf16> to vector<8x128xbf16>
    %517 = arith.extf %516 : vector<8x128xbf16> to vector<8x128xf32>
    %cst_183 = arith.constant 1.11111116 : f32
    %518 = vector.broadcast %cst_183 : f32 to vector<8x128xf32>
    %519 = arith.mulf %517, %518 : vector<8x128xf32>
    %520 = arith.mulf %514, %519 : vector<8x128xf32>
    %c15_184 = arith.constant 15 : index
    %c0_185 = arith.constant 0 : index
    %c0_186 = arith.constant 0 : index
    %521 = vector.load %arg9[%c15_184, %c0_185, %c0_186] : memref<16x8x128xf32, #tpu.memory_space<vmem>>, vector<1x8x128xf32>
    %522 = vector.shape_cast %521 : vector<1x8x128xf32> to vector<8x128xf32>
    %523 = vector.shape_cast %520 : vector<8x128xf32> to vector<1x8x128xf32>
    tpu.vector_store %arg9[%c15_184, %c0_185, %c0_186], %523 {strides = array<i32>} : memref<16x8x128xf32, #tpu.memory_space<vmem>>, vector<1x8x128xf32>,
    %c0_187 = arith.constant 0 : index
    %c0_188 = arith.constant 0 : index
    %524 = vector.load %arg10[%c0_187, %c0_188] : memref<8x128xf32, #tpu.memory_space<vmem>>, vector<8x128xf32>
    tpu.vector_store %arg10[%c0_187, %c0_188], %510 {strides = array<i32>} : memref<8x128xf32, #tpu.memory_space<vmem>>, vector<8x128xf32>,
    %c0_189 = arith.constant 0 : index
    %c0_190 = arith.constant 0 : index
    %525 = vector.load %arg11[%c0_189, %c0_190] : memref<8x128xf32, #tpu.memory_space<vmem>>, vector<8x128xf32>
    tpu.vector_store %arg11[%c0_189, %c0_190], %502 {strides = array<i32>} : memref<8x128xf32, #tpu.memory_space<vmem>>, vector<8x128xf32>,
    %c0_191 = arith.constant 0 : index
    %c0_192 = arith.constant 0 : index
    %526 = vector.load %arg12[%c0_191, %c0_192] : memref<8x128xf32, #tpu.memory_space<vmem>>, vector<8x128xf32>
    tpu.vector_store %arg12[%c0_191, %c0_192], %514 {strides = array<i32>} : memref<8x128xf32, #tpu.memory_space<vmem>>, vector<8x128xf32>,
    return
  }
  func.func @transform_0(%arg0: i32, %arg1: i32) -> (i32, i32, i32) {
    %c0_i32 = arith.constant 0 : i32
    %c0_i32_0 = arith.constant 0 : i32
    return %arg1, %arg0, %c0_i32 : i32, i32, i32
  }
  func.func @transform_1(%arg0: i32, %arg1: i32) -> (i32, i32, i32) {
    %c0_i32 = arith.constant 0 : i32
    %c0_i32_0 = arith.constant 0 : i32
    return %arg1, %arg0, %c0_i32 : i32, i32, i32
  }
  func.func @transform_2(%arg0: i32, %arg1: i32) -> (i32, i32) {
    %c0_i32 = arith.constant 0 : i32
    %c0_i32_0 = arith.constant 0 : i32
    %c0_i32_1 = arith.constant 0 : i32
    return %c0_i32, %c0_i32_0 : i32, i32
  }
  func.func @transform_3(%arg0: i32, %arg1: i32) -> (i32, i32) {
    %c0_i32 = arith.constant 0 : i32
    %c0_i32_0 = arith.constant 0 : i32
    %c0_i32_1 = arith.constant 0 : i32
    return %c0_i32, %c0_i32_0 : i32, i32
  }
  func.func @transform_4(%arg0: i32, %arg1: i32) -> (i32, i32) {
    %c0_i32 = arith.constant 0 : i32
    %c0_i32_0 = arith.constant 0 : i32
    return %arg0, %c0_i32 : i32, i32
  }
  func.func @transform_5(%arg0: i32, %arg1: i32) -> (i32, i32) {
    %c0_i32 = arith.constant 0 : i32
    %c0_i32_0 = arith.constant 0 : i32
    return %arg0, %c0_i32 : i32, i32
  }
  func.func @transform_6(%arg0: i32, %arg1: i32) -> (i32, i32) {
    %c0_i32 = arith.constant 0 : i32
    %c0_i32_0 = arith.constant 0 : i32
    return %arg0, %c0_i32 : i32, i32
  }
  func.func @transform_7(%arg0: i32, %arg1: i32) -> (i32, i32, i32) {
    %c0_i32 = arith.constant 0 : i32
    %c0_i32_0 = arith.constant 0 : i32
    return %arg1, %arg0, %c0_i32 : i32, i32, i32
  }
}

</mosaic_0001>

<bundles_post_ra>
// kernel: _lambda_.2
= control target key start
LH: loop header
LB: loop body
LE: loop exit
PB: predicated region body
PF: predicated region fallthrough
CT: control target
= control target key end

     0   :  { %s545_s1 = inlined_call_operand.vmem [shape: bf16[128,128], index: 1, kind: input, shape index: {}]   ;;  %s546_s0 = inlined_call_operand.vmem [shape: bf16[16,8,128], index: 0, kind: input, shape index: {}]   ;;  %s547_s2 = inlined_call_operand.vmem [shape: bf16[16,8,128], index: 2, kind: output, shape index: {0}]   ;;  %s548_s3 = inlined_call_operand.vmem [shape: f32[1,2,128], index: 3, kind: output, shape index: {1}]  }
   0x1   :  { %v369_v0 = vld [vmem:[%s545_s1 + $0x38] sm:$0xff]  ;;  %v368_v1 = vld [vmem:[%s545_s1 + $0x30] sm:$0xff]  ;;  %v367_v2 = vld [vmem:[%s545_s1 + $0x28] sm:$0xff] }
   0x2   :  { %141 = vmatpush.bf16.msra.mxu0 %v369_v0  ;;  %417 = vmatpush.bf16.msra.mxu1 %v369_v0  ;;  %v366_v3 = vld [vmem:[%s545_s1 + $0x20] sm:$0xff]  ;;  %v365_v4 = vld [vmem:[%s545_s1 + $0x18] sm:$0xff]  ;;  %v364_v5 = vld [vmem:[%s545_s1 + $0x10] sm:$0xff] }
   0x3   :  { %418 = vmatpush.bf16.msra.mxu2 %v369_v0  ;;  %419 = vmatpush.bf16.msra.mxu3 %v369_v0  ;;  %v363_v6 = vld [vmem:[%s545_s1 + $0x8] sm:$0xff]  ;;  %v362_v7 = vld [vmem:[%s545_s1] sm:$0xff]  ;;  %v356_v9 = vld [vmem:[%s546_s0 + $0x10] sm:$0xff] }
   0x4   :  { %v354_v8 = vld [vmem:[%s546_s0] sm:$0xff]  ;;  %v360_v11 = vld [vmem:[%s546_s0 + $0x30] sm:$0xff]  ;;  %v355_v12 = vld [vmem:[%s546_s0 + $0x8] sm:$0xff] }
   0x5   :  { %v358_v10 = vld [vmem:[%s546_s0 + $0x20] sm:$0xff]  ;;  %v357_v13 = vld [vmem:[%s546_s0 + $0x18] sm:$0xff]  ;;  %v359_v14 = vld [vmem:[%s546_s0 + $0x28] sm:$0xff] }
   0x6   :  { %142 = vmatpush.bf16.msra.mxu0 %v368_v1  ;;  %420 = vmatpush.bf16.msra.mxu1 %v368_v1  ;;  %v361_v15 = vld [vmem:[%s546_s0 + $0x38] sm:$0xff] }
   0x7   :  { %421 = vmatpush.bf16.msra.mxu2 %v368_v1  ;;  %422 = vmatpush.bf16.msra.mxu3 %v368_v1 }
   0xa   :  { %143 = vmatpush.bf16.msra.mxu0 %v367_v2  ;;  %423 = vmatpush.bf16.msra.mxu1 %v367_v2 }
   0xb   :  { %424 = vmatpush.bf16.msra.mxu2 %v367_v2  ;;  %425 = vmatpush.bf16.msra.mxu3 %v367_v2 }
   0xe   :  { %144 = vmatpush.bf16.msra.mxu0 %v366_v3  ;;  %426 = vmatpush.bf16.msra.mxu1 %v366_v3 }
   0xf   :  { %427 = vmatpush.bf16.msra.mxu2 %v366_v3  ;;  %428 = vmatpush.bf16.msra.mxu3 %v366_v3 }
  0x12   :  { %145 = vmatpush.bf16.msra.mxu0 %v365_v4  ;;  %429 = vmatpush.bf16.msra.mxu1 %v365_v4 }
  0x13   :  { %430 = vmatpush.bf16.msra.mxu2 %v365_v4  ;;  %431 = vmatpush.bf16.msra.mxu3 %v365_v4 }
  0x16   :  { %146 = vmatpush.bf16.msra.mxu0 %v364_v5  ;;  %432 = vmatpush.bf16.msra.mxu1 %v364_v5 }
  0x17   :  { %433 = vmatpush.bf16.msra.mxu2 %v364_v5  ;;  %434 = vmatpush.bf16.msra.mxu3 %v364_v5 }
  0x1a   :  { %147 = vmatpush.bf16.msra.mxu0 %v363_v6  ;;  %435 = vmatpush.bf16.msra.mxu1 %v363_v6 }
  0x1b   :  { %436 = vmatpush.bf16.msra.mxu2 %v363_v6  ;;  %437 = vmatpush.bf16.msra.mxu3 %v363_v6 }
  0x1e   :  { %148 = vmatpush.bf16.msra.mxu0 %v362_v7  ;;  %438 = vmatpush.bf16.msra.mxu1 %v362_v7 }
  0x1f   :  { %439 = vmatpush.bf16.msra.mxu2 %v362_v7  ;;  %440 = vmatpush.bf16.msra.mxu3 %v362_v7 }
  0x21   :  { %149 = vmatmul.bf16.vlgmr.msra.gmra.mxu0 %v354_v8  ;;  %159 = vmatmul.bf16.vlgmr.msra.gmra.mxu1 %v356_v9 }
  0x22   :  { %169 = vmatmul.bf16.vlgmr.msra.gmra.mxu2 %v358_v10  ;;  %179 = vmatmul.bf16.vlgmr.msra.gmra.mxu3 %v360_v11 }
  0x31   :  { %154 = vmatmul.bf16.gmra.mxu0 %v355_v12  ;;  %164 = vmatmul.bf16.gmra.mxu1 %v357_v13 }
  0x32   :  { %174 = vmatmul.bf16.gmra.mxu2 %v359_v14  ;;  %184 = vmatmul.bf16.gmra.mxu3 %v361_v15 }
  0x9e   :  { %v150_v16 = vpop.f32.mrf.mxu0  ;;  %v160_v17 = vpop.f32.mrf.mxu1 }
  0x9f   :  { %v244_v31 = vmul.f32 %v150_v16, %v150_v16  ;;  %v248_v45 = vmul.f32 %v160_v17, %v160_v17 }
  0xa5   :  { %v170_v18 = vpop.f32.mrf.mxu2  ;;  %v509_v19 = vpop.f32.mrf.mxu3 }
  0xa6   :  { %v152_v20 = vpop.f32.mrf.mxu0  ;;  %v162_v21 = vpop.f32.mrf.mxu1  ;;  %v252_v61 = vmul.f32 %v170_v18, %v170_v18  ;;  %v256_v9 = vmul.f32 %v509_v19, %v509_v19 }
  0xa7   :  { %v373_v22 = vpack.c.bf16 %v152_v20, %v150_v16  ;;  %v383_v23 = vpack.c.bf16 %v162_v21, %v160_v17  ;;  %v245_v30 = vmul.f32 %v152_v20, %v152_v20  ;;  %v222_v33 = vadd.f32 %v152_v20, %v150_v16 }
  0xa8   :  { %v249_v48 = vmul.f32 %v162_v21, %v162_v21 }
  0xa9   :  { %374 = vst [vmem:[%s547_s2] sm:$0xff] %v373_v22   ;;  %v260_v34 = vadd.f32 %v245_v30, %v244_v31 }
  0xaa   :  { %411 = vst [vmem:[%s547_s2 + $0x10] sm:$0xff] %v383_v23  }
  0xad   :  { %v172_v24 = vpop.f32.mrf.mxu2  ;;  %v182_v25 = vpop.f32.mrf.mxu3 }
  0xae   :  { %v155_v26 = vpop.f32.mrf.mxu0  ;;  %v165_v27 = vpop.f32.mrf.mxu1  ;;  %v393_v28 = vpack.c.bf16 %v172_v24, %v170_v18  ;;  %v403_v29 = vpack.c.bf16 %v182_v25, %v509_v19  ;;  %v253_v0 = vmul.f32 %v172_v24, %v172_v24  ;;  %v257_v12 = vmul.f32 %v182_v25, %v182_v25 }
  0xaf   :  { %v246_v32 = vmul.f32 %v155_v26, %v155_v26  ;;  %v223_v35 = vadd.f32 %v222_v33, %v155_v26  ;;  %v250_v51 = vmul.f32 %v165_v27, %v165_v27 }
  0xb0   :  { %413 = vst [vmem:[%s547_s2 + $0x20] sm:$0xff] %v393_v28  }
  0xb1   :  { %415 = vst [vmem:[%s547_s2 + $0x30] sm:$0xff] %v403_v29   ;;  %v261_v38 = vadd.f32 %v260_v34, %v246_v32 }
  0xb5   :  { %v175_v36 = vpop.f32.mrf.mxu2  ;;  %v185_v37 = vpop.f32.mrf.mxu3 }
  0xb6   :  { %v157_v39 = vpop.f32.mrf.mxu0  ;;  %v167_v40 = vpop.f32.mrf.mxu1  ;;  %v254_v4 = vmul.f32 %v175_v36, %v175_v36  ;;  %v258_v16 = vmul.f32 %v185_v37, %v185_v37 }
  0xb7   :  { %v378_v41 = vpack.c.bf16 %v157_v39, %v155_v26  ;;  %v224_v42 = vadd.f32 %v223_v35, %v157_v39  ;;  %v247_v43 = vmul.f32 %v157_v39, %v157_v39  ;;  %v388_v44 = vpack.c.bf16 %v167_v40, %v165_v27 }
  0xb8   :  { %v251_v59 = vmul.f32 %v167_v40, %v167_v40 }
  0xb9   :  { %410 = vst [vmem:[%s547_s2 + $0x8] sm:$0xff] %v378_v41   ;;  %v225_v46 = vadd.f32 %v224_v42, %v160_v17  ;;  %v262_v47 = vadd.f32 %v261_v38, %v247_v43 }
  0xba   :  { %412 = vst [vmem:[%s547_s2 + $0x18] sm:$0xff] %v388_v44  }
  0xbb   :  { %v263_v49 = vadd.f32 %v262_v47, %v248_v45  ;;  %v226_v50 = vadd.f32 %v225_v46, %v162_v21 }
  0xbd   :  { %v227_v52 = vadd.f32 %v226_v50, %v165_v27  ;;  %v264_v53 = vadd.f32 %v263_v49, %v249_v48  ;;  %v177_v54 = vpop.f32.mrf.mxu2  ;;  %v187_v55 = vpop.f32.mrf.mxu3 }
  0xbe   :  { %v398_v56 = vpack.c.bf16 %v177_v54, %v175_v36  ;;  %v408_v57 = vpack.c.bf16 %v187_v55, %v185_v37  ;;  %v255_v8 = vmul.f32 %v177_v54, %v177_v54  ;;  %v259_v21 = vmul.f32 %v187_v55, %v187_v55 }
  0xbf   :  { %v228_v58 = vadd.f32 %v227_v52, %v167_v40  ;;  %v265_v60 = vadd.f32 %v264_v53, %v250_v51 }
  0xc0   :  { %414 = vst [vmem:[%s547_s2 + $0x28] sm:$0xff] %v398_v56  }
  0xc1   :  { %v229_v62 = vadd.f32 %v228_v58, %v170_v18  ;;  %v266_v63 = vadd.f32 %v265_v60, %v251_v59  ;;  %416 = vst [vmem:[%s547_s2 + $0x38] sm:$0xff] %v408_v57  }
  0xc3   :  { %v267_v1 = vadd.f32 %v266_v63, %v252_v61  ;;  %v230_v2 = vadd.f32 %v229_v62, %v172_v24 }
  0xc5   :  { %v231_v3 = vadd.f32 %v230_v2, %v175_v36  ;;  %v268_v5 = vadd.f32 %v267_v1, %v253_v0 }
  0xc7   :  { %v269_v6 = vadd.f32 %v268_v5, %v254_v4  ;;  %v232_v7 = vadd.f32 %v231_v3, %v177_v54 }
  0xc9   :  { %v233_v10 = vadd.f32 %v232_v7, %v509_v19  ;;  %v270_v11 = vadd.f32 %v269_v6, %v255_v8 }
  0xcb   :  { %v271_v13 = vadd.f32 %v270_v11, %v256_v9  ;;  %v234_v14 = vadd.f32 %v233_v10, %v182_v25 }
  0xcd   :  { %v235_v15 = vadd.f32 %v234_v14, %v185_v37  ;;  %v272_v17 = vadd.f32 %v271_v13, %v257_v12 }
  0xcf   :  { %v273_v18 = vadd.f32 %v272_v17, %v258_v16  ;;  %v236_v20 = vadd.f32 %v235_v15, %v187_v55 }
  0xd1   :  { %v237_v22 = vrot.slane %v236_v20, 4  ;;  %v274_v23 = vadd.f32 %v273_v18, %v259_v21 }
  0xd3   :  { %v238_v24 = vadd.f32 %v237_v22, %v236_v20  ;;  %v275_v26 = vrot.slane %v274_v23, 4 }
  0xd5   :  { %v239_v27 = vrot.slane %v238_v24, 2  ;;  %v276_v28 = vadd.f32 %v275_v26, %v274_v23 }
  0xd7   :  { %v240_v29 = vadd.f32 %v239_v27, %v238_v24  ;;  %v277_v30 = vrot.slane %v276_v28, 2 }
  0xd9   :  { %v241_v31 = vrot.slane %v240_v29, 1  ;;  %v278_v19 = vadd.f32 %v277_v30, %v276_v28 }
  0xdb   :  { %v242_v32 = vadd.f32 %v241_v31, %v240_v29  ;;  %v279_v33 = vrot.slane %v278_v19, 1 }
  0xdd   :  { %243 = vst [vmem:[%s548_s3] sm:$0x1] %v242_v32  ;;  %v280_v25 = vadd.f32 %v279_v33, %v278_v19 }
  0xdf   :  { %281 = vst [vmem:[%s548_s3 + $0x1] sm:$0x1] %v280_v25 }

// kernel: _lambda_.3
= control target key start
LH: loop header
LB: loop body
LE: loop exit
PB: predicated region body
PF: predicated region fallthrough
CT: control target
= control target key end

     0   :  { %v888_v42 = vmov 0.0   ;;  %v889_v46 = vmov 1.0|1.0   ;;  %s1373_s2 = inlined_call_operand.vmem [shape: bf16[128,128], index: 2, kind: input, shape index: {}]   ;;  %s1374_s6 = inlined_call_operand.vmem [shape: f32[8,128], index: 6, kind: input, shape index: {}]   ;;  %s1375_s3 = inlined_call_operand.vmem [shape: f32[8,128], index: 3, kind: input, shape index: {}]   ;;  %s1376_s0 = inlined_call_operand.vmem [shape: bf16[16,8,128], index: 0, kind: input, shape index: {}]   ;;  %s1377_s4 = inlined_call_operand.vmem [shape: f32[8,128], index: 4, kind: input, shape index: {}]   ;;  %s1378_s5 = inlined_call_operand.vmem [shape: f32[8,128], index: 5, kind: input, shape index: {}]   ;;  %s1379_s1 = inlined_call_operand.vmem [shape: bf16[16,8,128], index: 1, kind: input, shape index: {}]   ;;  %s1380_s7 = inlined_call_operand.vmem [shape: f32[16,8,128], index: 7, kind: output, shape index: {}]  }
   0x1   :  { %v933_v0 = vld [vmem:[%s1373_s2 + $0x38] sm:$0xff]  ;;  %v939_v1 = vld [vmem:[%s1373_s2 + $0x30] sm:$0xff]  ;;  %v948_v2 = vld [vmem:[%s1373_s2 + $0x28] sm:$0xff] }
   0x2   :  { %121 = vmatpush.bf16.msra.mxu0 %v933_v0  ;;  %159 = vmatpush.bf16.msra.mxu1 %v933_v0  ;;  %v957_v3 = vld [vmem:[%s1373_s2 + $0x20] sm:$0xff]  ;;  %v966_v4 = vld [vmem:[%s1373_s2 + $0x18] sm:$0xff]  ;;  %v975_v5 = vld [vmem:[%s1373_s2 + $0x10] sm:$0xff] }
   0x3   :  { %199 = vmatpush.bf16.msra.mxu2 %v933_v0  ;;  %239 = vmatpush.bf16.msra.mxu3 %v933_v0  ;;  %v984_v6 = vld [vmem:[%s1373_s2 + $0x8] sm:$0xff]  ;;  %v993_v7 = vld [vmem:[%s1373_s2] sm:$0xff] }
   0x4   :  { %v998_v8 = vld [vmem:[%s1374_s6] sm:$0xff] }
   0x5   :  { %v72_v9 = vpack.c.bf16 %v998_v8, %v998_v8  ;;  %v36_v10 = vld [vmem:[%s1375_s3] sm:$0xff] }
   0x6   :  { %122 = vmatpush.bf16.msra.mxu0 %v939_v1  ;;  %160 = vmatpush.bf16.msra.mxu1 %v939_v1  ;;  %v63_v11 = vld [vmem:[%s1376_s0] sm:$0xf]  ;;  %v1055_v12 = vperm.slane %v36_v10, 2  ;;  %v1057_v13 = vperm.slane %v36_v10, 1  ;;  %v1065_v16 = vperm.slane %v36_v10, 4  ;;  %v1067_v18 = vperm.slane %v36_v10, 3 }
   0x7   :  { %200 = vmatpush.bf16.msra.mxu2 %v939_v1  ;;  %240 = vmatpush.bf16.msra.mxu3 %v939_v1  ;;  %v30_v14 = vld [vmem:[%s1377_s4] sm:$0xff]  ;;  %v64_v17 = vunpack.c.l.bf16 %v63_v11  ;;  %v1071_v21 = vperm.slane %v36_v10, 5  ;;  %v1076_v25 = vperm.slane %v36_v10, 0 }
   0x8   :  { %v32_v15 = vld [vmem:[%s1378_s5] sm:$0xff]  ;;  %v68_v19 = vmul.f32 %v1055_v12, %v30_v14  ;;  %v70_v23 = vmul.f32 %v1067_v18, %v998_v8  ;;  %v134_v27 = vsub.f32 %v30_v14, %v998_v8 }
   0x9   :  { %v67_v20 = vmul.f32 %v1057_v13, %v32_v15  ;;  %v65_v22 = vmul.f32 %v64_v17, %v1065_v16  ;;  %v143_v30 = vld [vmem:[%s1379_s1] sm:$0xff]   ;;  %v1084_v31 = vsub.f32 1.0, %v1076_v25 }
   0xa   :  { %123 = vmatpush.bf16.msra.mxu0 %v948_v2  ;;  %161 = vmatpush.bf16.msra.mxu1 %v948_v2  ;;  %v135_v33 = vmul.f32 %v134_v27, %v1076_v25  ;;  %v144_v35 = vunpack.c.l.bf16 %v143_v30  ;;  %v788_v50 = vld [vmem:[%s1376_s0 + $0x4] sm:$0xff]   ;;  %v183_v57 = vunpack.c.h.bf16 %v143_v30 }
   0xb   :  { %201 = vmatpush.bf16.msra.mxu2 %v948_v2  ;;  %241 = vmatpush.bf16.msra.mxu3 %v948_v2  ;;  %v69_v24 = vadd.f32 %v68_v19, %v67_v20  ;;  %v66_v26 = vadd.f32 %v65_v22, %v1071_v21  ;;  %v150_v51 = vunpack.c.l.bf16 %v788_v50  ;;  %v190_v19 = vunpack.c.h.bf16 %v788_v50 }
   0xc   :  { %v145_v39 = vmul.f32 1.1111112, %v144_v35  ;;  %v184_v61 = vmul.f32 1.1111112, %v183_v57 }
   0xd   :  { %v71_v28 = vadd.f32 %v70_v23, %v69_v24  ;;  %v151_v52 = vmul.f32 %v150_v51, %v1065_v16  ;;  %v191_v20 = vmul.f32 %v190_v19, %v1065_v16  ;;  %v798_v24 = vld [vmem:[%s1379_s1 + $0x8] sm:$0xff]  }
   0xe   :  { %124 = vmatpush.bf16.msra.mxu0 %v957_v3  ;;  %162 = vmatpush.bf16.msra.mxu1 %v957_v3 }
   0xf   :  { %202 = vmatpush.bf16.msra.mxu2 %v957_v3  ;;  %242 = vmatpush.bf16.msra.mxu3 %v957_v3  ;;  %v153_v38 = vmul.f32 %v71_v28, %v1057_v13  ;;  %v152_v53 = vadd.f32 %v151_v52, %v1071_v21  ;;  %v192_v22 = vadd.f32 %v191_v20, %v1071_v21  ;;  %v263_v52 = vunpack.c.h.bf16 %v798_v24 }
  0x12   :  { %125 = vmatpush.bf16.msra.mxu0 %v966_v4  ;;  %163 = vmatpush.bf16.msra.mxu1 %v966_v4 }
  0x13   :  { %203 = vmatpush.bf16.msra.mxu2 %v966_v4  ;;  %243 = vmatpush.bf16.msra.mxu3 %v966_v4 }
  0x16   :  { %126 = vmatpush.bf16.msra.mxu0 %v975_v5  ;;  %164 = vmatpush.bf16.msra.mxu1 %v975_v5 }
  0x17   :  { %204 = vmatpush.bf16.msra.mxu2 %v975_v5  ;;  %244 = vmatpush.bf16.msra.mxu3 %v975_v5 }
  0x1a   :  { %127 = vmatpush.bf16.msra.mxu0 %v984_v6  ;;  %165 = vmatpush.bf16.msra.mxu1 %v984_v6 }
  0x1b   :  { %205 = vmatpush.bf16.msra.mxu2 %v984_v6  ;;  %245 = vmatpush.bf16.msra.mxu3 %v984_v6 }
  0x1e   :  { %128 = vmatpush.bf16.msra.mxu0 %v993_v7  ;;  %166 = vmatpush.bf16.msra.mxu1 %v993_v7 }
  0x1f   :  { %206 = vmatpush.bf16.msra.mxu2 %v993_v7  ;;  %246 = vmatpush.bf16.msra.mxu3 %v993_v7 }
  0x21   :  { %129 = vmatmul.bf16.vlgmr.msra.gmra.mxu0 %v72_v9 }
  0x22   :  { %279 = vmatpush.bf16.msrb.mxu0 %v933_v0  ;;  %319 = vmatpush.bf16.msrb.mxu1 %v933_v0 }
  0x23   :  { %359 = vmatpush.bf16.msrb.mxu2 %v933_v0  ;;  %399 = vmatpush.bf16.msrb.mxu3 %v933_v0 }
  0x26   :  { %280 = vmatpush.bf16.msrb.mxu0 %v939_v1  ;;  %320 = vmatpush.bf16.msrb.mxu1 %v939_v1 }
  0x27   :  { %360 = vmatpush.bf16.msrb.mxu2 %v939_v1  ;;  %400 = vmatpush.bf16.msrb.mxu3 %v939_v1 }
  0x2a   :  { %281 = vmatpush.bf16.msrb.mxu0 %v948_v2  ;;  %321 = vmatpush.bf16.msrb.mxu1 %v948_v2 }
  0x2b   :  { %361 = vmatpush.bf16.msrb.mxu2 %v948_v2  ;;  %401 = vmatpush.bf16.msrb.mxu3 %v948_v2 }
  0x2e   :  { %282 = vmatpush.bf16.msrb.mxu0 %v957_v3  ;;  %322 = vmatpush.bf16.msrb.mxu1 %v957_v3 }
  0x2f   :  { %362 = vmatpush.bf16.msrb.mxu2 %v957_v3  ;;  %402 = vmatpush.bf16.msrb.mxu3 %v957_v3 }
  0x32   :  { %283 = vmatpush.bf16.msrb.mxu0 %v966_v4  ;;  %323 = vmatpush.bf16.msrb.mxu1 %v966_v4 }
  0x33   :  { %363 = vmatpush.bf16.msrb.mxu2 %v966_v4  ;;  %403 = vmatpush.bf16.msrb.mxu3 %v966_v4 }
  0x36   :  { %284 = vmatpush.bf16.msrb.mxu0 %v975_v5  ;;  %324 = vmatpush.bf16.msrb.mxu1 %v975_v5 }
  0x37   :  { %364 = vmatpush.bf16.msrb.mxu2 %v975_v5  ;;  %404 = vmatpush.bf16.msrb.mxu3 %v975_v5 }
  0x3a   :  { %285 = vmatpush.bf16.msrb.mxu0 %v984_v6  ;;  %325 = vmatpush.bf16.msrb.mxu1 %v984_v6 }
  0x3b   :  { %365 = vmatpush.bf16.msrb.mxu2 %v984_v6  ;;  %405 = vmatpush.bf16.msrb.mxu3 %v984_v6 }
  0x3e   :  { %286 = vmatpush.bf16.msrb.mxu0 %v993_v7  ;;  %326 = vmatpush.bf16.msrb.mxu1 %v993_v7 }
  0x3f   :  { %366 = vmatpush.bf16.msrb.mxu2 %v993_v7  ;;  %406 = vmatpush.bf16.msrb.mxu3 %v993_v7 }
  0x42   :  { %439 = vmatpush.bf16.msra.mxu0 %v933_v0 }
  0x46   :  { %440 = vmatpush.bf16.msra.mxu0 %v939_v1 }
  0x4a   :  { %441 = vmatpush.bf16.msra.mxu0 %v948_v2 }
  0x4e   :  { %442 = vmatpush.bf16.msra.mxu0 %v957_v3 }
  0x52   :  { %443 = vmatpush.bf16.msra.mxu0 %v966_v4 }
  0x56   :  { %444 = vmatpush.bf16.msra.mxu0 %v975_v5 }
  0x5a   :  { %445 = vmatpush.bf16.msra.mxu0 %v984_v6 }
  0x5e   :  { %446 = vmatpush.bf16.msra.mxu0 %v993_v7 }
  0x9e   :  { %v130_v29 = vpop.f32.mrf.mxu0 }
  0x9f   :  { %v136_v32 = vadd.f32 %v130_v29, %v66_v26 }
  0xa1   :  { %v137_v34 = vsub.f32 %v136_v32, %v71_v28  ;;  %v223_v28 = vunpack.c.l.bf16 %v798_v24 }
  0xa3   :  { %v138_v36 = vmul.f32 %v137_v34, %v1084_v31 }
  0xa5   :  { %v139_v37 = vadd.f32 %v138_v36, %v135_v33  ;;  %v224_v33 = vmul.f32 1.1111112, %v223_v28 }
  0xa6   :  { %v132_v40 = vpop.f32.mrf.mxu0 }
  0xa7   :  { %vm140_vm0 = vcmp.gt.f32.partialorder %v139_v37, 1.0  ;;  %v154_v41 = vmul.f32 %v139_v37, %v1055_v12 }
  0xa8   :  { %v787_v43 = vsel %vm140_vm0, 1.0, %v888_v42  ;;  %vm789_vm1 = vmpackc.low %vm140_vm0, %vm140_vm0 }
  0xa9   :  { %v146_v44 = vmul.f32 %v787_v43, %v145_v39  ;;  %v156_v45 = vmul.f32 %v787_v43, %v1067_v18  ;;  %790 = vmatmul.msk.bf16.vlgmr.msra.gmra.mxu1 %vm789_vm1, %v889_v46  ;;  %v172_v47 = vsub.f32 %v139_v37, %v787_v43  ;;  %v155_v48 = vadd.f32 %v154_v41, %v153_v38 }
  0xaa   :  { %479 = vmatpush.bf16.msra.mxu1 %v933_v0 }
  0xab   :  { %147 = vst [vmem:[%s1380_s7] sm:$0xff] %v146_v44  ;;  %v157_v49 = vadd.f32 %v156_v45, %v155_v48  ;;  %v173_v58 = vmul.f32 %v172_v47, %v1076_v25  ;;  %v800_v44 = vld [vmem:[%s1376_s0 + $0xc] sm:$0xff]  }
  0xac   :  { %v230_v45 = vunpack.c.l.bf16 %v800_v44 }
  0xad   :  { %v193_v63 = vmul.f32 %v157_v49, %v1057_v13 }
  0xae   :  { %480 = vmatpush.bf16.msra.mxu1 %v939_v1  ;;  %v231_v47 = vmul.f32 %v230_v45, %v1065_v16 }
  0xb0   :  { %v232_v48 = vadd.f32 %v231_v47, %v1071_v21 }
  0xb2   :  { %481 = vmatpush.bf16.msra.mxu1 %v948_v2 }
  0xb6   :  { %482 = vmatpush.bf16.msra.mxu1 %v957_v3 }
  0xba   :  { %483 = vmatpush.bf16.msra.mxu1 %v966_v4 }
  0xbe   :  { %484 = vmatpush.bf16.msra.mxu1 %v975_v5 }
  0xc2   :  { %485 = vmatpush.bf16.msra.mxu1 %v984_v6 }
  0xc6   :  { %486 = vmatpush.bf16.msra.mxu1 %v993_v7 }
 0x126   :  { %v168_v54 = vpop.f32.mrf.mxu1 }
 0x127   :  { %v174_v55 = vadd.f32 %v168_v54, %v152_v53 }
 0x129   :  { %v175_v56 = vsub.f32 %v174_v55, %v157_v49 }
 0x12b   :  { %v176_v59 = vmul.f32 %v175_v56, %v1084_v31  ;;  %v264_v56 = vmul.f32 1.1111112, %v263_v52 }
 0x12d   :  { %v177_v60 = vadd.f32 %v176_v59, %v173_v58 }
 0x12e   :  { %v170_v62 = vpop.f32.mrf.mxu1 }
 0x12f   :  { %vm178_vm2 = vcmp.gt.f32.partialorder %v177_v60, 1.0  ;;  %v194_v8 = vmul.f32 %v177_v60, %v1055_v12 }
 0x130   :  { %v791_v9 = vsel %vm178_vm2, 1.0, %v888_v42  ;;  %vm795_vm3 = vmpackc.low %vm178_vm2, %vm178_vm2 }
 0x131   :  { %v185_v10 = vmul.f32 %v791_v9, %v184_v61  ;;  %v196_v11 = vmul.f32 %v791_v9, %v1067_v18  ;;  %796 = vmatmul.msk.bf16.vlgmr.msra.gmra.mxu2 %vm795_vm3, %v889_v46  ;;  %v212_v14 = vsub.f32 %v177_v60, %v791_v9  ;;  %v195_v15 = vadd.f32 %v194_v8, %v193_v63 }
 0x132   :  { %519 = vmatpush.bf16.msra.mxu2 %v933_v0 }
 0x133   :  { %793 = vst [vmem:[%s1380_s7 + $0x8] sm:$0xff] %v185_v10  ;;  %v197_v17 = vadd.f32 %v196_v11, %v195_v15  ;;  %v213_v29 = vmul.f32 %v212_v14, %v1076_v25  ;;  %v270_v10 = vunpack.c.h.bf16 %v800_v44 }
 0x135   :  { %v233_v35 = vmul.f32 %v197_v17, %v1057_v13  ;;  %v271_v11 = vmul.f32 %v270_v10, %v1065_v16 }
 0x136   :  { %520 = vmatpush.bf16.msra.mxu2 %v939_v1 }
 0x137   :  { %v272_v14 = vadd.f32 %v271_v11, %v1071_v21 }
 0x13a   :  { %521 = vmatpush.bf16.msra.mxu2 %v948_v2 }
 0x13e   :  { %522 = vmatpush.bf16.msra.mxu2 %v957_v3 }
 0x142   :  { %523 = vmatpush.bf16.msra.mxu2 %v966_v4 }
 0x146   :  { %524 = vmatpush.bf16.msra.mxu2 %v975_v5 }
 0x14a   :  { %525 = vmatpush.bf16.msra.mxu2 %v984_v6 }
 0x14e   :  { %526 = vmatpush.bf16.msra.mxu2 %v993_v7 }
 0x1b4   :  { %v208_v23 = vpop.f32.mrf.mxu2 }
 0x1b5   :  { %v214_v26 = vadd.f32 %v208_v23, %v192_v22 }
 0x1b7   :  { %v215_v27 = vsub.f32 %v214_v26, %v197_v17  ;;  %v810_v17 = vld [vmem:[%s1379_s1 + $0x10] sm:$0xff]  }
 0x1b8   :  { %v303_v22 = vunpack.c.l.bf16 %v810_v17  ;;  %v343_v47 = vunpack.c.h.bf16 %v810_v17 }
 0x1b9   :  { %v216_v30 = vmul.f32 %v215_v27, %v1084_v31 }
 0x1ba   :  { %v304_v27 = vmul.f32 1.1111112, %v303_v22 }
 0x1bb   :  { %v217_v32 = vadd.f32 %v216_v30, %v213_v29 }
 0x1bc   :  { %v210_v34 = vpop.f32.mrf.mxu2 }
 0x1bd   :  { %vm218_vm4 = vcmp.gt.f32.partialorder %v217_v32, 1.0  ;;  %v234_v36 = vmul.f32 %v217_v32, %v1055_v12 }
 0x1be   :  { %v797_v37 = vsel %vm218_vm4, 1.0, %v888_v42  ;;  %vm801_vm5 = vmpackc.low %vm218_vm4, %vm218_vm4 }
 0x1bf   :  { %v225_v38 = vmul.f32 %v797_v37, %v224_v33  ;;  %v236_v39 = vmul.f32 %v797_v37, %v1067_v18  ;;  %802 = vmatmul.msk.bf16.vlgmr.msra.gmra.mxu3 %vm801_vm5, %v889_v46  ;;  %v252_v40 = vsub.f32 %v217_v32, %v797_v37  ;;  %v235_v41 = vadd.f32 %v234_v36, %v233_v35 }
 0x1c0   :  { %559 = vmatpush.bf16.msra.mxu3 %v933_v0 }
 0x1c1   :  { %799 = vst [vmem:[%s1380_s7 + $0x10] sm:$0xff] %v225_v38  ;;  %v237_v43 = vadd.f32 %v236_v39, %v235_v41  ;;  %v253_v53 = vmul.f32 %v252_v40, %v1076_v25  ;;  %v812_v38 = vld [vmem:[%s1376_s0 + $0x14] sm:$0xff]  }
 0x1c2   :  { %v310_v39 = vunpack.c.l.bf16 %v812_v38 }
 0x1c3   :  { %v273_v58 = vmul.f32 %v237_v43, %v1057_v13 }
 0x1c4   :  { %560 = vmatpush.bf16.msra.mxu3 %v939_v1  ;;  %v311_v40 = vmul.f32 %v310_v39, %v1065_v16 }
 0x1c6   :  { %v312_v41 = vadd.f32 %v311_v40, %v1071_v21 }
 0x1c8   :  { %561 = vmatpush.bf16.msra.mxu3 %v948_v2 }
 0x1cc   :  { %562 = vmatpush.bf16.msra.mxu3 %v957_v3 }
 0x1d0   :  { %563 = vmatpush.bf16.msra.mxu3 %v966_v4 }
 0x1d4   :  { %564 = vmatpush.bf16.msra.mxu3 %v975_v5 }
 0x1d8   :  { %565 = vmatpush.bf16.msra.mxu3 %v984_v6 }
 0x1dc   :  { %566 = vmatpush.bf16.msra.mxu3 %v993_v7 }
 0x242   :  { %v248_v49 = vpop.f32.mrf.mxu3 }
 0x243   :  { %v254_v50 = vadd.f32 %v248_v49, %v232_v48 }
 0x245   :  { %v255_v51 = vsub.f32 %v254_v50, %v237_v43 }
 0x247   :  { %v256_v54 = vmul.f32 %v255_v51, %v1084_v31  ;;  %v344_v51 = vmul.f32 1.1111112, %v343_v47 }
 0x249   :  { %v257_v55 = vadd.f32 %v256_v54, %v253_v53 }
 0x24a   :  { %v250_v57 = vpop.f32.mrf.mxu3 }
 0x24b   :  { %vm258_vm6 = vcmp.gt.f32.partialorder %v257_v55, 1.0  ;;  %v274_v59 = vmul.f32 %v257_v55, %v1055_v12 }
 0x24c   :  { %v803_v60 = vsel %vm258_vm6, 1.0, %v888_v42  ;;  %vm807_vm7 = vmpackc.low %vm258_vm6, %vm258_vm6 }
 0x24d   :  { %v265_v61 = vmul.f32 %v803_v60, %v264_v56  ;;  %808 = vmatmul.msk.bf16.vlgmr.msrb.gmra.mxu0 %vm807_vm7, %v889_v46  ;;  %v292_v62 = vsub.f32 %v257_v55, %v803_v60  ;;  %v275_v63 = vadd.f32 %v274_v59, %v273_v58  ;;  %v276_v8 = vmul.f32 %v803_v60, %v1067_v18 }
 0x24e   :  { %599 = vmatpush.bf16.msrb.mxu0 %v933_v0 }
 0x24f   :  { %805 = vst [vmem:[%s1380_s7 + $0x18] sm:$0xff] %v265_v61  ;;  %v277_v9 = vadd.f32 %v276_v8, %v275_v63  ;;  %v293_v23 = vmul.f32 %v292_v62, %v1076_v25  ;;  %v350_v61 = vunpack.c.h.bf16 %v812_v38 }
 0x251   :  { %v313_v29 = vmul.f32 %v277_v9, %v1057_v13  ;;  %v351_v62 = vmul.f32 %v350_v61, %v1065_v16 }
 0x252   :  { %600 = vmatpush.bf16.msrb.mxu0 %v939_v1 }
 0x253   :  { %v352_v63 = vadd.f32 %v351_v62, %v1071_v21 }
 0x256   :  { %601 = vmatpush.bf16.msrb.mxu0 %v948_v2 }
 0x25a   :  { %602 = vmatpush.bf16.msrb.mxu0 %v957_v3 }
 0x25e   :  { %603 = vmatpush.bf16.msrb.mxu0 %v966_v4 }
 0x262   :  { %604 = vmatpush.bf16.msrb.mxu0 %v975_v5 }
 0x266   :  { %605 = vmatpush.bf16.msrb.mxu0 %v984_v6 }
 0x26a   :  { %606 = vmatpush.bf16.msrb.mxu0 %v993_v7 }
 0x2ca   :  { %v288_v15 = vpop.f32.mrf.mxu0 }
 0x2cb   :  { %v294_v19 = vadd.f32 %v288_v15, %v272_v14 }
 0x2cd   :  { %v295_v20 = vsub.f32 %v294_v19, %v277_v9  ;;  %v822_v9 = vld [vmem:[%s1379_s1 + $0x18] sm:$0xff]  }
 0x2ce   :  { %v383_v14 = vunpack.c.l.bf16 %v822_v9 }
 0x2cf   :  { %v296_v24 = vmul.f32 %v295_v20, %v1084_v31 }
 0x2d0   :  { %v384_v20 = vmul.f32 1.1111112, %v383_v14 }
 0x2d1   :  { %v297_v26 = vadd.f32 %v296_v24, %v293_v23 }
 0x2d2   :  { %v290_v28 = vpop.f32.mrf.mxu0 }
 0x2d3   :  { %vm298_vm8 = vcmp.gt.f32.partialorder %v297_v26, 1.0  ;;  %v314_v30 = vmul.f32 %v297_v26, %v1055_v12 }
 0x2d4   :  { %v809_v32 = vsel %vm298_vm8, 1.0, %v888_v42  ;;  %vm813_vm9 = vmpackc.low %vm298_vm8, %vm298_vm8 }
 0x2d5   :  { %v305_v33 = vmul.f32 %v809_v32, %v304_v27  ;;  %814 = vmatmul.msk.bf16.vlgmr.msrb.gmra.mxu1 %vm813_vm9, %v889_v46  ;;  %v332_v34 = vsub.f32 %v297_v26, %v809_v32  ;;  %v315_v35 = vadd.f32 %v314_v30, %v313_v29  ;;  %v316_v36 = vmul.f32 %v809_v32, %v1067_v18 }
 0x2d6   :  { %639 = vmatpush.bf16.msrb.mxu1 %v933_v0 }
 0x2d7   :  { %811 = vst [vmem:[%s1380_s7 + $0x20] sm:$0xff] %v305_v33  ;;  %v317_v37 = vadd.f32 %v316_v36, %v315_v35  ;;  %v333_v48 = vmul.f32 %v332_v34, %v1076_v25  ;;  %v423_v36 = vunpack.c.h.bf16 %v822_v9 }
 0x2d9   :  { %v353_v53 = vmul.f32 %v317_v37, %v1057_v13 }
 0x2da   :  { %640 = vmatpush.bf16.msrb.mxu1 %v939_v1 }
 0x2de   :  { %641 = vmatpush.bf16.msrb.mxu1 %v948_v2 }
 0x2e2   :  { %642 = vmatpush.bf16.msrb.mxu1 %v957_v3 }
 0x2e6   :  { %643 = vmatpush.bf16.msrb.mxu1 %v966_v4 }
 0x2ea   :  { %644 = vmatpush.bf16.msrb.mxu1 %v975_v5 }
 0x2ee   :  { %645 = vmatpush.bf16.msrb.mxu1 %v984_v6 }
 0x2f2   :  { %646 = vmatpush.bf16.msrb.mxu1 %v993_v7 }
 0x352   :  { %v328_v43 = vpop.f32.mrf.mxu1 }
 0x353   :  { %v334_v44 = vadd.f32 %v328_v43, %v312_v41 }
 0x355   :  { %v335_v45 = vsub.f32 %v334_v44, %v317_v37  ;;  %v424_v37 = vmul.f32 1.1111112, %v423_v36 }
 0x357   :  { %v336_v49 = vmul.f32 %v335_v45, %v1084_v31 }
 0x359   :  { %v337_v50 = vadd.f32 %v336_v49, %v333_v48 }
 0x35a   :  { %v330_v52 = vpop.f32.mrf.mxu1 }
 0x35b   :  { %vm338_vm10 = vcmp.gt.f32.partialorder %v337_v50, 1.0  ;;  %v354_v54 = vmul.f32 %v337_v50, %v1055_v12  ;;  %v834_v52 = vld [vmem:[%s1379_s1 + $0x20] sm:$0xff]  }
 0x35c   :  { %v815_v55 = vsel %vm338_vm10, 1.0, %v888_v42  ;;  %vm819_vm11 = vmpackc.low %vm338_vm10, %vm338_vm10 }
 0x35d   :  { %v345_v56 = vmul.f32 %v815_v55, %v344_v51  ;;  %820 = vmatmul.msk.bf16.vlgmr.msrb.gmra.mxu2 %vm819_vm11, %v889_v46  ;;  %v372_v57 = vsub.f32 %v337_v50, %v815_v55  ;;  %v355_v58 = vadd.f32 %v354_v54, %v353_v53  ;;  %v356_v59 = vmul.f32 %v815_v55, %v1067_v18 }
 0x35e   :  { %679 = vmatpush.bf16.msrb.mxu2 %v933_v0  ;;  %v463_v55 = vunpack.c.l.bf16 %v834_v52 }
 0x35f   :  { %817 = vst [vmem:[%s1380_s7 + $0x28] sm:$0xff] %v345_v56  ;;  %v357_v60 = vadd.f32 %v356_v59, %v355_v58  ;;  %v373_v15 = vmul.f32 %v372_v57, %v1076_v25 }
 0x360   :  { %v464_v59 = vmul.f32 1.1111112, %v463_v55 }
 0x361   :  { %v393_v23 = vmul.f32 %v357_v60, %v1057_v13 }
 0x362   :  { %680 = vmatpush.bf16.msrb.mxu2 %v939_v1 }
 0x366   :  { %681 = vmatpush.bf16.msrb.mxu2 %v948_v2 }
 0x36a   :  { %682 = vmatpush.bf16.msrb.mxu2 %v957_v3 }
 0x36e   :  { %683 = vmatpush.bf16.msrb.mxu2 %v966_v4 }
 0x372   :  { %684 = vmatpush.bf16.msrb.mxu2 %v975_v5 }
 0x376   :  { %685 = vmatpush.bf16.msrb.mxu2 %v984_v6 }
 0x37a   :  { %686 = vmatpush.bf16.msrb.mxu2 %v993_v7 }
 0x3e0   :  { %v368_v8 = vpop.f32.mrf.mxu2 }
 0x3e1   :  { %v374_v10 = vadd.f32 %v368_v8, %v352_v63 }
 0x3e3   :  { %v375_v11 = vsub.f32 %v374_v10, %v357_v60 }
 0x3e5   :  { %v376_v17 = vmul.f32 %v375_v11, %v1084_v31 }
 0x3e7   :  { %v377_v19 = vadd.f32 %v376_v17, %v373_v15  ;;  %v836_v15 = vld [vmem:[%s1376_s0 + $0x24] sm:$0xff]  }
 0x3e8   :  { %v370_v22 = vpop.f32.mrf.mxu2  ;;  %v470_v17 = vunpack.c.l.bf16 %v836_v15 }
 0x3e9   :  { %vm378_vm12 = vcmp.gt.f32.partialorder %v377_v19, 1.0  ;;  %v394_v24 = vmul.f32 %v377_v19, %v1055_v12 }
 0x3ea   :  { %v821_v26 = vsel %vm378_vm12, 1.0, %v888_v42  ;;  %vm825_vm13 = vmpackc.low %vm378_vm12, %vm378_vm12 }
 0x3eb   :  { %v385_v27 = vmul.f32 %v821_v26, %v384_v20  ;;  %826 = vmatmul.msk.bf16.vlgmr.msrb.gmra.mxu3 %vm825_vm13, %v889_v46  ;;  %v412_v28 = vsub.f32 %v377_v19, %v821_v26  ;;  %v395_v29 = vadd.f32 %v394_v24, %v393_v23  ;;  %v396_v30 = vmul.f32 %v821_v26, %v1067_v18 }
 0x3ec   :  { %719 = vmatpush.bf16.msrb.mxu3 %v933_v0  ;;  %v824_v0 = vld [vmem:[%s1376_s0 + $0x1c] sm:$0xff]   ;;  %v471_v19 = vmul.f32 %v470_v17, %v1065_v16  ;;  %v503_v26 = vunpack.c.h.bf16 %v834_v52 }
 0x3ed   :  { %823 = vst [vmem:[%s1380_s7 + $0x30] sm:$0xff] %v385_v27  ;;  %v397_v32 = vadd.f32 %v396_v30, %v395_v29  ;;  %v390_v33 = vunpack.c.l.bf16 %v824_v0  ;;  %v430_v48 = vunpack.c.h.bf16 %v824_v0 }
 0x3ee   :  { %v472_v20 = vadd.f32 %v471_v19, %v1071_v21  ;;  %v504_v30 = vmul.f32 1.1111112, %v503_v26 }
 0x3ef   :  { %v391_v34 = vmul.f32 %v390_v33, %v1065_v16  ;;  %v433_v38 = vmul.f32 %v397_v32, %v1057_v13  ;;  %v431_v49 = vmul.f32 %v430_v48, %v1065_v16 }
 0x3f0   :  { %720 = vmatpush.bf16.msrb.mxu3 %v939_v1 }
 0x3f1   :  { %v392_v1 = vadd.f32 %v391_v34, %v1071_v21  ;;  %v432_v50 = vadd.f32 %v431_v49, %v1071_v21 }
 0x3f4   :  { %721 = vmatpush.bf16.msrb.mxu3 %v948_v2 }
 0x3f8   :  { %722 = vmatpush.bf16.msrb.mxu3 %v957_v3 }
 0x3fc   :  { %723 = vmatpush.bf16.msrb.mxu3 %v966_v4  ;;  %v413_v4 = vmul.f32 %v412_v28, %v1076_v25 }
 0x400   :  { %724 = vmatpush.bf16.msrb.mxu3 %v975_v5 }
 0x404   :  { %725 = vmatpush.bf16.msrb.mxu3 %v984_v6 }
 0x408   :  { %726 = vmatpush.bf16.msrb.mxu3 %v993_v7 }
 0x46e   :  { %v408_v2 = vpop.f32.mrf.mxu3 }
 0x46f   :  { %v414_v35 = vadd.f32 %v408_v2, %v392_v1 }
 0x471   :  { %v415_v3 = vsub.f32 %v414_v35, %v397_v32 }
 0x473   :  { %v416_v5 = vmul.f32 %v415_v3, %v1084_v31 }
 0x475   :  { %v417_v6 = vadd.f32 %v416_v5, %v413_v4  ;;  %v510_v4 = vunpack.c.h.bf16 %v836_v15 }
 0x476   :  { %v410_v7 = vpop.f32.mrf.mxu3 }
 0x477   :  { %vm418_vm14 = vcmp.gt.f32.partialorder %v417_v6, 1.0  ;;  %v434_v39 = vmul.f32 %v417_v6, %v1055_v12  ;;  %v511_v5 = vmul.f32 %v510_v4, %v1065_v16  ;;  %v846_v7 = vld [vmem:[%s1379_s1 + $0x28] sm:$0xff]  }
 0x478   :  { %v827_v40 = vsel %vm418_vm14, 1.0, %v888_v42  ;;  %vm831_vm15 = vmpackc.low %vm418_vm14, %vm418_vm14 }
 0x479   :  { %v425_v41 = vmul.f32 %v827_v40, %v424_v37  ;;  %832 = vmatmul.msk.bf16.vlgmr.msra.gmra.mxu0 %vm831_vm15, %v889_v46  ;;  %v452_v43 = vsub.f32 %v417_v6, %v827_v40  ;;  %v435_v44 = vadd.f32 %v434_v39, %v433_v38  ;;  %v436_v45 = vmul.f32 %v827_v40, %v1067_v18 }
 0x47a   :  { %v512_v6 = vadd.f32 %v511_v5, %v1071_v21  ;;  %v543_v40 = vunpack.c.l.bf16 %v846_v7 }
 0x47b   :  { %829 = vst [vmem:[%s1380_s7 + $0x38] sm:$0xff] %v425_v41  ;;  %v437_v47 = vadd.f32 %v436_v45, %v435_v44  ;;  %v453_v56 = vmul.f32 %v452_v43, %v1076_v25 }
 0x47c   :  { %v544_v45 = vmul.f32 1.1111112, %v543_v40 }
 0x47d   :  { %v473_v61 = vmul.f32 %v437_v47, %v1057_v13 }
 0x4f6   :  { %v448_v51 = vpop.f32.mrf.mxu0 }
 0x4f7   :  { %v454_v53 = vadd.f32 %v448_v51, %v432_v50 }
 0x4f9   :  { %v455_v54 = vsub.f32 %v454_v53, %v437_v47 }
 0x4fb   :  { %v456_v57 = vmul.f32 %v455_v54, %v1084_v31 }
 0x4fd   :  { %v457_v58 = vadd.f32 %v456_v57, %v453_v56  ;;  %v848_v56 = vld [vmem:[%s1376_s0 + $0x2c] sm:$0xff]  }
 0x4fe   :  { %v450_v60 = vpop.f32.mrf.mxu0  ;;  %v550_v57 = vunpack.c.l.bf16 %v848_v56 }
 0x4ff   :  { %vm458_vm0 = vcmp.gt.f32.partialorder %v457_v58, 1.0  ;;  %v474_v62 = vmul.f32 %v457_v58, %v1055_v12 }
 0x500   :  { %v833_v63 = vsel %vm458_vm0, 1.0, %v888_v42  ;;  %vm837_vm1 = vmpackc.low %vm458_vm0, %vm458_vm0 }
 0x501   :  { %v465_v8 = vmul.f32 %v833_v63, %v464_v59  ;;  %838 = vmatmul.msk.bf16.vlgmr.msra.gmra.mxu1 %vm837_vm1, %v889_v46  ;;  %v492_v9 = vsub.f32 %v457_v58, %v833_v63  ;;  %v475_v10 = vadd.f32 %v474_v62, %v473_v61  ;;  %v476_v11 = vmul.f32 %v833_v63, %v1067_v18 }
 0x502   :  { %v551_v58 = vmul.f32 %v550_v57, %v1065_v16  ;;  %v583_v63 = vunpack.c.h.bf16 %v846_v7 }
 0x503   :  { %835 = vst [vmem:[%s1380_s7 + $0x40] sm:$0xff] %v465_v8  ;;  %v477_v14 = vadd.f32 %v476_v11, %v475_v10  ;;  %v493_v27 = vmul.f32 %v492_v9, %v1076_v25 }
 0x504   :  { %v552_v59 = vadd.f32 %v551_v58, %v1071_v21  ;;  %v584_v11 = vmul.f32 1.1111112, %v583_v63 }
 0x505   :  { %v513_v0 = vmul.f32 %v477_v14, %v1057_v13 }
 0x57e   :  { %v488_v22 = vpop.f32.mrf.mxu1 }
 0x57f   :  { %v494_v23 = vadd.f32 %v488_v22, %v472_v20 }
 0x581   :  { %v495_v24 = vsub.f32 %v494_v23, %v477_v14 }
 0x583   :  { %v496_v28 = vmul.f32 %v495_v24, %v1084_v31 }
 0x585   :  { %v497_v29 = vadd.f32 %v496_v28, %v493_v27  ;;  %v590_v27 = vunpack.c.h.bf16 %v848_v56 }
 0x586   :  { %v490_v32 = vpop.f32.mrf.mxu1 }
 0x587   :  { %vm498_vm2 = vcmp.gt.f32.partialorder %v497_v29, 1.0  ;;  %v514_v33 = vmul.f32 %v497_v29, %v1055_v12  ;;  %v591_v28 = vmul.f32 %v590_v27, %v1065_v16  ;;  %v858_v32 = vld [vmem:[%s1379_s1 + $0x30] sm:$0xff]  }
 0x588   :  { %v839_v34 = vsel %vm498_vm2, 1.0, %v888_v42  ;;  %vm843_vm3 = vmpackc.low %vm498_vm2, %vm498_vm2 }
 0x589   :  { %v505_v1 = vmul.f32 %v839_v34, %v504_v30  ;;  %844 = vmatmul.msk.bf16.vlgmr.msra.gmra.mxu2 %vm843_vm3, %v889_v46  ;;  %v532_v2 = vsub.f32 %v497_v29, %v839_v34  ;;  %v515_v35 = vadd.f32 %v514_v33, %v513_v0  ;;  %v516_v3 = vmul.f32 %v839_v34, %v1067_v18 }
 0x58a   :  { %v592_v29 = vadd.f32 %v591_v28, %v1071_v21  ;;  %v623_v34 = vunpack.c.l.bf16 %v858_v32 }
 0x58b   :  { %841 = vst [vmem:[%s1380_s7 + $0x48] sm:$0xff] %v505_v1  ;;  %v517_v36 = vadd.f32 %v516_v3, %v515_v35  ;;  %v533_v41 = vmul.f32 %v532_v2, %v1076_v25 }
 0x58c   :  { %v624_v3 = vmul.f32 1.1111112, %v623_v34 }
 0x58d   :  { %v553_v48 = vmul.f32 %v517_v36, %v1057_v13 }
 0x60c   :  { %v528_v37 = vpop.f32.mrf.mxu2 }
 0x60d   :  { %v534_v38 = vadd.f32 %v528_v37, %v512_v6 }
 0x60f   :  { %v535_v39 = vsub.f32 %v534_v38, %v517_v36 }
 0x611   :  { %v536_v43 = vmul.f32 %v535_v39, %v1084_v31 }
 0x613   :  { %v537_v44 = vadd.f32 %v536_v43, %v533_v41  ;;  %v860_v41 = vld [vmem:[%s1376_s0 + $0x34] sm:$0xff]  }
 0x614   :  { %v530_v47 = vpop.f32.mrf.mxu2  ;;  %v630_v43 = vunpack.c.l.bf16 %v860_v41 }
 0x615   :  { %vm538_vm4 = vcmp.gt.f32.partialorder %v537_v44, 1.0  ;;  %v554_v49 = vmul.f32 %v537_v44, %v1055_v12 }
 0x616   :  { %v845_v50 = vsel %vm538_vm4, 1.0, %v888_v42  ;;  %vm849_vm5 = vmpackc.low %vm538_vm4, %vm538_vm4 }
 0x617   :  { %v545_v51 = vmul.f32 %v845_v50, %v544_v45  ;;  %850 = vmatmul.msk.bf16.vlgmr.msra.gmra.mxu3 %vm849_vm5, %v889_v46  ;;  %v572_v52 = vsub.f32 %v537_v44, %v845_v50  ;;  %v555_v53 = vadd.f32 %v554_v49, %v553_v48  ;;  %v556_v54 = vmul.f32 %v845_v50, %v1067_v18 }
 0x618   :  { %v631_v44 = vmul.f32 %v630_v43, %v1065_v16  ;;  %v663_v50 = vunpack.c.h.bf16 %v858_v32 }
 0x619   :  { %847 = vst [vmem:[%s1380_s7 + $0x50] sm:$0xff] %v545_v51  ;;  %v557_v55 = vadd.f32 %v556_v54, %v555_v53  ;;  %v573_v8 = vmul.f32 %v572_v52, %v1076_v25 }
 0x61a   :  { %v632_v45 = vadd.f32 %v631_v44, %v1071_v21  ;;  %v664_v54 = vmul.f32 1.1111112, %v663_v50 }
 0x61b   :  { %v593_v15 = vmul.f32 %v557_v55, %v1057_v13 }
 0x69a   :  { %v568_v60 = vpop.f32.mrf.mxu3 }
 0x69b   :  { %v574_v61 = vadd.f32 %v568_v60, %v552_v59 }
 0x69d   :  { %v575_v62 = vsub.f32 %v574_v61, %v557_v55 }
 0x69f   :  { %v576_v9 = vmul.f32 %v575_v62, %v1084_v31 }
 0x6a1   :  { %v577_v10 = vadd.f32 %v576_v9, %v573_v8  ;;  %v670_v8 = vunpack.c.h.bf16 %v860_v41 }
 0x6a2   :  { %v570_v14 = vpop.f32.mrf.mxu3 }
 0x6a3   :  { %vm578_vm6 = vcmp.gt.f32.partialorder %v577_v10, 1.0  ;;  %v594_v17 = vmul.f32 %v577_v10, %v1055_v12  ;;  %v671_v9 = vmul.f32 %v670_v8, %v1065_v16  ;;  %v870_v14 = vld [vmem:[%s1379_s1 + $0x38] sm:$0xff]  }
 0x6a4   :  { %v851_v19 = vsel %vm578_vm6, 1.0, %v888_v42  ;;  %vm855_vm7 = vmpackc.low %vm578_vm6, %vm578_vm6 }
 0x6a5   :  { %v585_v20 = vmul.f32 %v851_v19, %v584_v11  ;;  %856 = vmatmul.msk.bf16.vlgmr.msrb.gmra.mxu0 %vm855_vm7, %v889_v46  ;;  %v612_v22 = vsub.f32 %v577_v10, %v851_v19  ;;  %v595_v23 = vadd.f32 %v594_v17, %v593_v15  ;;  %v596_v24 = vmul.f32 %v851_v19, %v1067_v18 }
 0x6a6   :  { %v672_v10 = vadd.f32 %v671_v9, %v1071_v21  ;;  %v703_v19 = vunpack.c.l.bf16 %v870_v14 }
 0x6a7   :  { %853 = vst [vmem:[%s1380_s7 + $0x58] sm:$0xff] %v585_v20  ;;  %v597_v26 = vadd.f32 %v596_v24, %v595_v23  ;;  %v613_v1 = vmul.f32 %v612_v22, %v1076_v25 }
 0x6a8   :  { %v704_v24 = vmul.f32 1.1111112, %v703_v19 }
 0x6a9   :  { %v633_v4 = vmul.f32 %v597_v26, %v1057_v13 }
 0x722   :  { %v608_v30 = vpop.f32.mrf.mxu0 }
 0x723   :  { %v614_v0 = vadd.f32 %v608_v30, %v592_v29 }
 0x725   :  { %v615_v33 = vsub.f32 %v614_v0, %v597_v26 }
 0x727   :  { %v616_v2 = vmul.f32 %v615_v33, %v1084_v31 }
 0x729   :  { %v617_v35 = vadd.f32 %v616_v2, %v613_v1 }
 0x72a   :  { %v610_v36 = vpop.f32.mrf.mxu0 }
 0x72b   :  { %vm618_vm8 = vcmp.gt.f32.partialorder %v617_v35, 1.0  ;;  %v634_v5 = vmul.f32 %v617_v35, %v1055_v12  ;;  %v743_v36 = vunpack.c.h.bf16 %v870_v14 }
 0x72c   :  { %v857_v6 = vsel %vm618_vm8, 1.0, %v888_v42  ;;  %vm861_vm9 = vmpackc.low %vm618_vm8, %vm618_vm8 }
 0x72d   :  { %v625_v37 = vmul.f32 %v857_v6, %v624_v3  ;;  %862 = vmatmul.msk.bf16.vlgmr.msrb.gmra.mxu1 %vm861_vm9, %v889_v46  ;;  %v652_v7 = vsub.f32 %v617_v35, %v857_v6  ;;  %v635_v38 = vadd.f32 %v634_v5, %v633_v4  ;;  %v636_v39 = vmul.f32 %v857_v6, %v1067_v18 }
 0x72e   :  { %v744_v6 = vmul.f32 1.1111112, %v743_v36 }
 0x72f   :  { %859 = vst [vmem:[%s1380_s7 + $0x60] sm:$0xff] %v625_v37  ;;  %v637_v40 = vadd.f32 %v636_v39, %v635_v38  ;;  %v653_v51 = vmul.f32 %v652_v7, %v1076_v25 }
 0x731   :  { %v673_v56 = vmul.f32 %v637_v40, %v1057_v13 }
 0x7aa   :  { %v648_v47 = vpop.f32.mrf.mxu1 }
 0x7ab   :  { %v654_v48 = vadd.f32 %v648_v47, %v632_v45 }
 0x7ad   :  { %v655_v49 = vsub.f32 %v654_v48, %v637_v40 }
 0x7af   :  { %v656_v52 = vmul.f32 %v655_v49, %v1084_v31 }
 0x7b1   :  { %v657_v53 = vadd.f32 %v656_v52, %v653_v51 }
 0x7b2   :  { %v650_v55 = vpop.f32.mrf.mxu1 }
 0x7b3   :  { %vm658_vm10 = vcmp.gt.f32.partialorder %v657_v53, 1.0  ;;  %v674_v57 = vmul.f32 %v657_v53, %v1055_v12 }
 0x7b4   :  { %v863_v58 = vsel %vm658_vm10, 1.0, %v888_v42  ;;  %vm867_vm11 = vmpackc.low %vm658_vm10, %vm658_vm10 }
 0x7b5   :  { %v665_v59 = vmul.f32 %v863_v58, %v664_v54  ;;  %868 = vmatmul.msk.bf16.vlgmr.msrb.gmra.mxu2 %vm867_vm11, %v889_v46  ;;  %v692_v60 = vsub.f32 %v657_v53, %v863_v58  ;;  %v675_v61 = vadd.f32 %v674_v57, %v673_v56  ;;  %v676_v62 = vmul.f32 %v863_v58, %v1067_v18 }
 0x7b7   :  { %865 = vst [vmem:[%s1380_s7 + $0x68] sm:$0xff] %v665_v59  ;;  %v677_v63 = vadd.f32 %v676_v62, %v675_v61  ;;  %v693_v20 = vmul.f32 %v692_v60, %v1076_v25 }
 0x7b9   :  { %v713_v27 = vmul.f32 %v677_v63, %v1057_v13  ;;  %v872_v13 = vld [vmem:[%s1376_s0 + $0x3c] sm:$0xf] }
 0x838   :  { %v688_v11 = vpop.f32.mrf.mxu2 }
 0x839   :  { %v694_v15 = vadd.f32 %v688_v11, %v672_v10 }
 0x83b   :  { %v695_v17 = vsub.f32 %v694_v15, %v677_v63 }
 0x83d   :  { %v696_v22 = vmul.f32 %v695_v17, %v1084_v31 }
 0x83f   :  { %v697_v23 = vadd.f32 %v696_v22, %v693_v20 }
 0x840   :  { %v690_v26 = vpop.f32.mrf.mxu2 }
 0x841   :  { %vm698_vm12 = vcmp.gt.f32.partialorder %v697_v23, 1.0  ;;  %v714_v28 = vmul.f32 %v697_v23, %v1055_v12  ;;  %v710_v12 = vunpack.c.l.bf16 %v872_v13 }
 0x842   :  { %v869_v29 = vsel %vm698_vm12, 1.0, %v888_v42  ;;  %vm873_vm13 = vmpackc.low %vm698_vm12, %vm698_vm12 }
 0x843   :  { %v705_v30 = vmul.f32 %v869_v29, %v704_v24  ;;  %874 = vmatmul.msk.bf16.vlgmr.msrb.gmra.mxu3 %vm873_vm13, %v889_v46  ;;  %v732_v32 = vsub.f32 %v697_v23, %v869_v29  ;;  %v715_v0 = vadd.f32 %v714_v28, %v713_v27  ;;  %v716_v33 = vmul.f32 %v869_v29, %v1067_v18 }
 0x844   :  { %v711_v1 = vmul.f32 %v710_v12, %v1065_v16 }
 0x845   :  { %871 = vst [vmem:[%s1380_s7 + $0x70] sm:$0xff] %v705_v30  ;;  %v717_v34 = vadd.f32 %v716_v33, %v715_v0  ;;  %v733_v18 = vmul.f32 %v732_v32, %v1076_v25 }
 0x846   :  { %v712_v2 = vadd.f32 %v711_v1, %v1071_v21 }
 0x8c6   :  { %v728_v35 = vpop.f32.mrf.mxu3 }
 0x8c7   :  { %v734_v46 = vadd.f32 %v728_v35, %v712_v2 }
 0x8c9   :  { %v735_v3 = vsub.f32 %v734_v46, %v717_v34 }
 0x8cb   :  { %v736_v4 = vmul.f32 %v735_v3, %v1084_v31 }
 0x8cd   :  { %v737_v5 = vadd.f32 %v736_v4, %v733_v18 }
 0x8ce   :  { %v730_v37 = vpop.f32.mrf.mxu3 }
 0x8cf   :  { %vm738_vm14 = vcmp.gt.f32.partialorder %v737_v5, 1.0 }
 0x8d0   :  { %v875_v7 = vsel %vm738_vm14, 1.0, %v888_v42 }
 0x8d1   :  { %v745_v38 = vmul.f32 %v875_v7, %v744_v6 }
 0x8d3   :  { %877 = vst [vmem:[%s1380_s7 + $0x78] sm:$0xff] %v745_v38 }

</bundles_post_ra>
